<compile_context>
chip_gen: v5e
topology: v5e:2x2
jax: 0.10.0
libtpu: 0.0.40
codegen_flags: <defaults>
</compile_context>

<pallas_src>
import functools

import jax
import jax.numpy as jnp
from jax import lax
from jax.experimental import pallas as pl
from jax.experimental.pallas import tpu as pltpu

BN_EPS = 1e-5
LEAKY_SLOPE = 0.01


def _round_up(n, m):
    return (n + m - 1) // m * m


def _vae_encoder_kernel(x_ref, w1_ref, p1_ref, w2_ref, p2_ref, o_ref):
    """Single-invocation forward.

    x_ref : (B, Fp)   flattened input (Fp = F padded to 128)
    w1_ref: (Fp, Hp)  Linear-1 weight (Hp = 400 padded to 512)
    p1_ref: (8, Hp)   rows 0/1/2 = bias1 / gamma1 / beta1 (padded cols are 0)
    w2_ref: (Hp, Lp)  Linear-2 weight (padded rows are 0)
    p2_ref: (8, Lp)   rows 0/1/2 = bias2 / gamma2 / beta2
    o_ref : (B, Lp)
    """
    # ---- Linear 1 (single MXU pass, f32 accumulate) ----
    h = jnp.dot(x_ref[...], w1_ref[...], preferred_element_type=jnp.float32)
    h = h + p1_ref[0:1, :]

    # ---- BatchNorm1d(400), training mode: biased batch stats over B ----
    mean1 = jnp.mean(h, axis=0, keepdims=True)
    var1 = jnp.mean((h - mean1) ** 2, axis=0, keepdims=True)
    h = (h - mean1) * lax.rsqrt(var1 + BN_EPS) * p1_ref[1:2, :] + p1_ref[2:3, :]

    # ---- LeakyReLU (default negative_slope = 0.01) ----
    h = jnp.where(h > 0, h, LEAKY_SLOPE * h)

    # ---- MLP([400, latent], last_activation=True): Linear -> BN -> ReLU ----
    z = jnp.dot(h, w2_ref[...], preferred_element_type=jnp.float32)
    z = z + p2_ref[0:1, :]

    mean2 = jnp.mean(z, axis=0, keepdims=True)
    var2 = jnp.mean((z - mean2) ** 2, axis=0, keepdims=True)
    z = (z - mean2) * lax.rsqrt(var2 + BN_EPS) * p2_ref[1:2, :] + p2_ref[2:3, :]

    o_ref[...] = jnp.maximum(z, 0.0).astype(o_ref.dtype)


@functools.partial(jax.jit, static_argnames=("weight_dtype",))
def vae_encoder_forward(x_nchw, params, *, weight_dtype=jnp.float32):
    """x_nchw: (B, C, H, W) float32. Returns (B, latent_dim) float32."""
    B = x_nchw.shape[0]
    x = x_nchw.reshape(B, -1).astype(jnp.float32)   # Flatten(), row-major
    F = x.shape[1]
    H = params["w1"].shape[1]                       # 400
    L = params["w2"].shape[1]                       # latent_dim (128)

    # Lane-align every feature dim to 128 (zero-padded; math is unaffected).
    Fp = _round_up(F, 128)
    Hp = _round_up(H, 128)                          # 400 -> 512
    Lp = _round_up(L, 128)

    x_p = x if Fp == F else jnp.pad(x, ((0, 0), (0, Fp - F)))
    w1_p = jnp.pad(params["w1"], ((0, Fp - F), (0, Hp - H))).astype(weight_dtype)
    w2_p = jnp.pad(params["w2"], ((0, Hp - H), (0, Lp - L))).astype(weight_dtype)

    # Pack bias/gamma/beta into one (8, Npad) slab per BN layer.  Padded
    # columns get bias = gamma = beta = 0, so padded hidden features stay
    # exactly 0 through BN/LeakyReLU, and the zero rows of w2 keep them out of
    # the second matmul and BN2 statistics.
    def _pack(b, g, be, n, npad):
        slab = jnp.zeros((8, npad), jnp.float32)
        slab = slab.at[0, :n].set(b.reshape(-1))
        slab = slab.at[1, :n].set(g.reshape(-1))
        slab = slab.at[2, :n].set(be.reshape(-1))
        return slab

    p1 = _pack(params["b1"], params["g1"], params["be1"], H, Hp)
    p2 = _pack(params["b2"], params["g2"], params["be2"], L, Lp)

    vmem = pl.BlockSpec(memory_space=pltpu.MemorySpace.VMEM)

    out = pl.pallas_call(
        _vae_encoder_kernel,
        out_shape=jax.ShapeDtypeStruct((B, Lp), jnp.float32),
        in_specs=[vmem, vmem, vmem, vmem, vmem],
        out_specs=vmem,
    )(x_p, w1_p, p1, w2_p, p2)
    return out[:, :L]


def make_params(key, flattened_size, hidden=400, latent_dim=128):
    """Deterministic synthetic params, PyTorch-Linear-style uniform init."""
    k1, k2, k3, k4 = jax.random.split(key, 4)
    lim1 = 1.0 / (flattened_size ** 0.5)
    lim2 = 1.0 / (hidden ** 0.5)
    return {
        # stored as (in, out) so the kernel computes x @ W
        "w1": jax.random.uniform(k1, (flattened_size, hidden), jnp.float32,
                                 -lim1, lim1),
        "b1": jax.random.uniform(k2, (1, hidden), jnp.float32, -lim1, lim1),
        "g1": jnp.ones((1, hidden), jnp.float32),    # BN weight
        "be1": jnp.zeros((1, hidden), jnp.float32),  # BN bias
        "w2": jax.random.uniform(k3, (hidden, latent_dim), jnp.float32,
                                 -lim2, lim2),
        "b2": jax.random.uniform(k4, (1, latent_dim), jnp.float32,
                                 -lim2, lim2),
        "g2": jnp.ones((1, latent_dim), jnp.float32),
        "be2": jnp.zeros((1, latent_dim), jnp.float32),
    }


def reference_forward(x_nchw, params):
    """Pure-JAX reference mirroring the PyTorch graph (training-mode BN)."""
    B = x_nchw.shape[0]
    x = x_nchw.reshape(B, -1)
    h = x @ params["w1"] + params["b1"]
    m, v = jnp.mean(h, 0, keepdims=True), jnp.var(h, 0, keepdims=True)
    h = (h - m) / jnp.sqrt(v + BN_EPS) * params["g1"] + params["be1"]
    h = jnp.where(h > 0, h, LEAKY_SLOPE * h)
    z = h @ params["w2"] + params["b2"]
    m2, v2 = jnp.mean(z, 0, keepdims=True), jnp.var(z, 0, keepdims=True)
    z = (z - m2) / jnp.sqrt(v2 + BN_EPS) * params["g2"] + params["be2"]
    return jnp.maximum(z, 0.0)


if __name__ == "__main__":
    key = jax.random.PRNGKey(0)
    kx, kp = jax.random.split(key)

    # shape = (C, H, W) = (4, 16, 16)  -> flattened_size = 1024
    B, C, H, W = 2, 4, 16, 16
    latent_dim = 128
    x = jax.random.normal(kx, (B, C, H, W), jnp.float32)

    params = make_params(kp, C * H * W, hidden=400, latent_dim=latent_dim)

    out = vae_encoder_forward(x, params)
    out = jax.block_until_ready(out)

    ref = reference_forward(x, params)
    assert out.shape == (B, latent_dim)
    assert jnp.allclose(out, ref, rtol=1e-4, atol=1e-4), "mismatch vs reference"

    print("KERNEL_OK")
</pallas_src>

<mosaic_0001>
module attributes {stable_mosaic.version = 11 : i64} {
  func.func @_vae_encoder_kernel(%arg0: memref<2x1024xf32, #tpu.memory_space<vmem>>, %arg1: memref<1024x512xf32, #tpu.memory_space<vmem>>, %arg2: memref<8x512xf32, #tpu.memory_space<vmem>>, %arg3: memref<512x128xf32, #tpu.memory_space<vmem>>, %arg4: memref<8x128xf32, #tpu.memory_space<vmem>>, %arg5: memref<2x128xf32, #tpu.memory_space<vmem>>) attributes {dimension_semantics = [], scalar_prefetch = 0 : i64, scratch_operands = 0 : i64, tpu.core_type = #tpu.core_type<tc>} {
    %c0 = arith.constant 0 : index
    %c0_0 = arith.constant 0 : index
    %0 = vector.load %arg0[%c0, %c0_0] : memref<2x1024xf32, #tpu.memory_space<vmem>>, vector<2x1024xf32>
    %c0_1 = arith.constant 0 : index
    %c0_2 = arith.constant 0 : index
    %1 = vector.load %arg1[%c0_1, %c0_2] : memref<1024x512xf32, #tpu.memory_space<vmem>>, vector<1024x512xf32>
    %cst = arith.constant dense<0.000000e+00> : vector<2x512xf32>
    %2 = tpu.matmul %0, %1, %cst {dimension_numbers = #tpu.dot_dimension_numbers<[1], [0], [0], [1], [0, 0, 1, 1], [], []>} : vector<2x1024xf32>, vector<1024x512xf32>, vector<2x512xf32> -> vector<2x512xf32>
    %c0_3 = arith.constant 0 : index
    %c0_4 = arith.constant 0 : index
    %3 = vector.load %arg2[%c0_3, %c0_4] : memref<8x512xf32, #tpu.memory_space<vmem>>, vector<1x512xf32>
    %4 = vector.broadcast %3 : vector<1x512xf32> to vector<2x512xf32>
    %5 = arith.addf %2, %4 : vector<2x512xf32>
    %cst_5 = arith.constant dense<0.000000e+00> : vector<512xf32>
    %6 = vector.multi_reduction <add>, %5, %cst_5 [0] : vector<2x512xf32> to vector<512xf32>
    %7 = vector.shape_cast %6 : vector<512xf32> to vector<1x512xf32>
    %cst_6 = arith.constant 2.000000e+00 : f32
    %8 = vector.broadcast %cst_6 : f32 to vector<1x512xf32>
    %9 = arith.divf %7, %8 : vector<1x512xf32>
    %10 = vector.broadcast %9 : vector<1x512xf32> to vector<2x512xf32>
    %11 = arith.subf %5, %10 : vector<2x512xf32>
    %12 = arith.mulf %11, %11 : vector<2x512xf32>
    %cst_7 = arith.constant dense<0.000000e+00> : vector<512xf32>
    %13 = vector.multi_reduction <add>, %12, %cst_7 [0] : vector<2x512xf32> to vector<512xf32>
    %14 = vector.shape_cast %13 : vector<512xf32> to vector<1x512xf32>
    %cst_8 = arith.constant 2.000000e+00 : f32
    %15 = vector.broadcast %cst_8 : f32 to vector<1x512xf32>
    %16 = arith.divf %14, %15 : vector<1x512xf32>
    %17 = vector.broadcast %9 : vector<1x512xf32> to vector<2x512xf32>
    %18 = arith.subf %5, %17 : vector<2x512xf32>
    %cst_9 = arith.constant 9.99999974E-6 : f32
    %19 = vector.broadcast %cst_9 : f32 to vector<1x512xf32>
    %20 = arith.addf %16, %19 : vector<1x512xf32>
    %21 = math.rsqrt %20 : vector<1x512xf32>
    %22 = vector.broadcast %21 : vector<1x512xf32> to vector<2x512xf32>
    %23 = arith.mulf %18, %22 : vector<2x512xf32>
    %c1 = arith.constant 1 : index
    %c0_10 = arith.constant 0 : index
    %24 = vector.load %arg2[%c1, %c0_10] : memref<8x512xf32, #tpu.memory_space<vmem>>, vector<1x512xf32>
    %25 = vector.broadcast %24 : vector<1x512xf32> to vector<2x512xf32>
    %26 = arith.mulf %23, %25 : vector<2x512xf32>
    %c2 = arith.constant 2 : index
    %c0_11 = arith.constant 0 : index
    %27 = vector.load %arg2[%c2, %c0_11] : memref<8x512xf32, #tpu.memory_space<vmem>>, vector<1x512xf32>
    %28 = vector.broadcast %27 : vector<1x512xf32> to vector<2x512xf32>
    %29 = arith.addf %26, %28 : vector<2x512xf32>
    %cst_12 = arith.constant 0.000000e+00 : f32
    %30 = vector.broadcast %cst_12 : f32 to vector<2x512xf32>
    %31 = arith.cmpf ogt, %29, %30 : vector<2x512xf32>
    %cst_13 = arith.constant 0.00999999977 : f32
    %32 = vector.broadcast %cst_13 : f32 to vector<2x512xf32>
    %33 = arith.mulf %32, %29 : vector<2x512xf32>
    %34 = arith.select %31, %29, %33 : vector<2x512xi1>, vector<2x512xf32>
    %c0_14 = arith.constant 0 : index
    %c0_15 = arith.constant 0 : index
    %35 = vector.load %arg3[%c0_14, %c0_15] : memref<512x128xf32, #tpu.memory_space<vmem>>, vector<512x128xf32>
    %cst_16 = arith.constant dense<0.000000e+00> : vector<2x128xf32>
    %36 = tpu.matmul %34, %35, %cst_16 {dimension_numbers = #tpu.dot_dimension_numbers<[1], [0], [0], [1], [0, 0, 1, 1], [], []>} : vector<2x512xf32>, vector<512x128xf32>, vector<2x128xf32> -> vector<2x128xf32>
    %c0_17 = arith.constant 0 : index
    %c0_18 = arith.constant 0 : index
    %37 = vector.load %arg4[%c0_17, %c0_18] : memref<8x128xf32, #tpu.memory_space<vmem>>, vector<1x128xf32>
    %38 = vector.broadcast %37 : vector<1x128xf32> to vector<2x128xf32>
    %39 = arith.addf %36, %38 : vector<2x128xf32>
    %cst_19 = arith.constant dense<0.000000e+00> : vector<128xf32>
    %40 = vector.multi_reduction <add>, %39, %cst_19 [0] : vector<2x128xf32> to vector<128xf32>
    %41 = vector.shape_cast %40 : vector<128xf32> to vector<1x128xf32>
    %cst_20 = arith.constant 2.000000e+00 : f32
    %42 = vector.broadcast %cst_20 : f32 to vector<1x128xf32>
    %43 = arith.divf %41, %42 : vector<1x128xf32>
    %44 = vector.broadcast %43 : vector<1x128xf32> to vector<2x128xf32>
    %45 = arith.subf %39, %44 : vector<2x128xf32>
    %46 = arith.mulf %45, %45 : vector<2x128xf32>
    %cst_21 = arith.constant dense<0.000000e+00> : vector<128xf32>
    %47 = vector.multi_reduction <add>, %46, %cst_21 [0] : vector<2x128xf32> to vector<128xf32>
    %48 = vector.shape_cast %47 : vector<128xf32> to vector<1x128xf32>
    %cst_22 = arith.constant 2.000000e+00 : f32
    %49 = vector.broadcast %cst_22 : f32 to vector<1x128xf32>
    %50 = arith.divf %48, %49 : vector<1x128xf32>
    %51 = vector.broadcast %43 : vector<1x128xf32> to vector<2x128xf32>
    %52 = arith.subf %39, %51 : vector<2x128xf32>
    %cst_23 = arith.constant 9.99999974E-6 : f32
    %53 = vector.broadcast %cst_23 : f32 to vector<1x128xf32>
    %54 = arith.addf %50, %53 : vector<1x128xf32>
    %55 = math.rsqrt %54 : vector<1x128xf32>
    %56 = vector.broadcast %55 : vector<1x128xf32> to vector<2x128xf32>
    %57 = arith.mulf %52, %56 : vector<2x128xf32>
    %c1_24 = arith.constant 1 : index
    %c0_25 = arith.constant 0 : index
    %58 = vector.load %arg4[%c1_24, %c0_25] : memref<8x128xf32, #tpu.memory_space<vmem>>, vector<1x128xf32>
    %59 = vector.broadcast %58 : vector<1x128xf32> to vector<2x128xf32>
    %60 = arith.mulf %57, %59 : vector<2x128xf32>
    %c2_26 = arith.constant 2 : index
    %c0_27 = arith.constant 0 : index
    %61 = vector.load %arg4[%c2_26, %c0_27] : memref<8x128xf32, #tpu.memory_space<vmem>>, vector<1x128xf32>
    %62 = vector.broadcast %61 : vector<1x128xf32> to vector<2x128xf32>
    %63 = arith.addf %60, %62 : vector<2x128xf32>
    %cst_28 = arith.constant 0.000000e+00 : f32
    %64 = vector.broadcast %cst_28 : f32 to vector<2x128xf32>
    %65 = arith.maximumf %63, %64 : vector<2x128xf32>
    %c0_29 = arith.constant 0 : index
    %c0_30 = arith.constant 0 : index
    %66 = vector.load %arg5[%c0_29, %c0_30] : memref<2x128xf32, #tpu.memory_space<vmem>>, vector<2x128xf32>
    tpu.vector_store %arg5[%c0_29, %c0_30], %65 {strides = array<i32>} : memref<2x128xf32, #tpu.memory_space<vmem>>, vector<2x128xf32>,
    return
  }
}

</mosaic_0001>

<bundles_post_ra>
// kernel: vae_encoder_forward.1
= control target key start
LH: loop header
LB: loop body
LE: loop exit
PB: predicated region body
PF: predicated region fallthrough
CT: control target
= control target key end

     0   :  { %s3559_s0 = inlined_call_operand.vmem [shape: f32[2,1024], index: 0, kind: input, shape index: {}]   ;;  %s3560_s1 = inlined_call_operand.vmem [shape: f32[1024,512], index: 1, kind: input, shape index: {}]   ;;  %s3561_s2 = inlined_call_operand.vmem [shape: f32[8,512], index: 2, kind: input, shape index: {}]   ;;  %s3562_s3 = inlined_call_operand.vmem [shape: f32[512,128], index: 3, kind: input, shape index: {}]   ;;  %s3563_s4 = inlined_call_operand.vmem [shape: f32[8,128], index: 4, kind: input, shape index: {}]   ;;  %s3564_s5 = inlined_call_operand.hbm [shape: f32[2,128], index: 5, kind: output, shape index: {}]  }
   0x1   :  { %v83_v0 = vld [vmem:[%s3560_s1 + $0x1e0] sm:$0xff] }
   0x2   :  { %v211_v1 = vld [vmem:[%s3560_s1 + $0x5e0] sm:$0xff]  ;;  %566 = vmatpush.msra.mxu0 %v83_v0 }
   0x3   :  { %v79_v2 = vld [vmem:[%s3560_s1 + $0x1c0] sm:$0xff]  ;;  %606 = vmatpush.msra.mxu2 %v211_v1 }
   0x4   :  { %v207_v3 = vld [vmem:[%s3560_s1 + $0x5c0] sm:$0xff]  ;;  %567 = vmatpush.msra.mxu0 %v79_v2 }
   0x5   :  { %v275_v4 = vld [vmem:[%s3560_s1 + $0x7e0] sm:$0xff]  ;;  %607 = vmatpush.msra.mxu2 %v207_v3 }
   0x6   :  { %v75_v5 = vld [vmem:[%s3560_s1 + $0x1a0] sm:$0xff]  ;;  %626 = vmatpush.msra.mxu3 %v275_v4 }
   0x7   :  { %v147_v6 = vld [vmem:[%s3560_s1 + $0x3e0] sm:$0xff]  ;;  %568 = vmatpush.msra.mxu0 %v75_v5 }
   0x8   :  { %v203_v7 = vld [vmem:[%s3560_s1 + $0x5a0] sm:$0xff]  ;;  %586 = vmatpush.msra.mxu1 %v147_v6 }
   0x9   :  { %v271_v8 = vld [vmem:[%s3560_s1 + $0x7c0] sm:$0xff]  ;;  %608 = vmatpush.msra.mxu2 %v203_v7 }
   0xa   :  { %v143_v9 = vld [vmem:[%s3560_s1 + $0x3c0] sm:$0xff]  ;;  %627 = vmatpush.msra.mxu3 %v271_v8 }
   0xb   :  { %v71_v10 = vld [vmem:[%s3560_s1 + $0x180] sm:$0xff]  ;;  %587 = vmatpush.msra.mxu1 %v143_v9 }
   0xc   :  { %v199_v11 = vld [vmem:[%s3560_s1 + $0x580] sm:$0xff]  ;;  %569 = vmatpush.msra.mxu0 %v71_v10 }
   0xd   :  { %v267_v12 = vld [vmem:[%s3560_s1 + $0x7a0] sm:$0xff]  ;;  %609 = vmatpush.msra.mxu2 %v199_v11 }
   0xe   :  { %v139_v13 = vld [vmem:[%s3560_s1 + $0x3a0] sm:$0xff]  ;;  %628 = vmatpush.msra.mxu3 %v267_v12 }
   0xf   :  { %v263_v14 = vld [vmem:[%s3560_s1 + $0x780] sm:$0xff]  ;;  %588 = vmatpush.msra.mxu1 %v139_v13 }
  0x10   :  { %v67_v15 = vld [vmem:[%s3560_s1 + $0x160] sm:$0xff]  ;;  %629 = vmatpush.msra.mxu3 %v263_v14 }
  0x11   :  { %v195_v16 = vld [vmem:[%s3560_s1 + $0x560] sm:$0xff]  ;;  %570 = vmatpush.msra.mxu0 %v67_v15 }
  0x12   :  { %v135_v17 = vld [vmem:[%s3560_s1 + $0x380] sm:$0xff]  ;;  %610 = vmatpush.msra.mxu2 %v195_v16 }
  0x13   :  { %v259_v18 = vld [vmem:[%s3560_s1 + $0x760] sm:$0xff]  ;;  %589 = vmatpush.msra.mxu1 %v135_v17 }
  0x14   :  { %v63_v19 = vld [vmem:[%s3560_s1 + $0x140] sm:$0xff]  ;;  %630 = vmatpush.msra.mxu3 %v259_v18 }
  0x15   :  { %v191_v20 = vld [vmem:[%s3560_s1 + $0x540] sm:$0xff]  ;;  %571 = vmatpush.msra.mxu0 %v63_v19 }
  0x16   :  { %v131_v21 = vld [vmem:[%s3560_s1 + $0x360] sm:$0xff]  ;;  %611 = vmatpush.msra.mxu2 %v191_v20 }
  0x17   :  { %v255_v22 = vld [vmem:[%s3560_s1 + $0x740] sm:$0xff]  ;;  %590 = vmatpush.msra.mxu1 %v131_v21 }
  0x18   :  { %v59_v23 = vld [vmem:[%s3560_s1 + $0x120] sm:$0xff]  ;;  %631 = vmatpush.msra.mxu3 %v255_v22 }
  0x19   :  { %v187_v24 = vld [vmem:[%s3560_s1 + $0x520] sm:$0xff]  ;;  %572 = vmatpush.msra.mxu0 %v59_v23 }
  0x1a   :  { %v127_v25 = vld [vmem:[%s3560_s1 + $0x340] sm:$0xff]  ;;  %612 = vmatpush.msra.mxu2 %v187_v24 }
  0x1b   :  { %v251_v26 = vld [vmem:[%s3560_s1 + $0x720] sm:$0xff]  ;;  %591 = vmatpush.msra.mxu1 %v127_v25 }
  0x1c   :  { %v55_v27 = vld [vmem:[%s3560_s1 + $0x100] sm:$0xff]  ;;  %632 = vmatpush.msra.mxu3 %v251_v26  ;;  %v22_v26 = vld [vmem:[%s3559_s0 + $0x8] sm:$0xff] }
  0x1d   :  { %v183_v28 = vld [vmem:[%s3560_s1 + $0x500] sm:$0xff]  ;;  %573 = vmatpush.msra.mxu0 %v55_v27  ;;  %549 = vst [vmem:[#allocation1 + $0x20] ss:$4 sm:$0xff] %v22_v26 }
  0x1e   :  { %v123_v29 = vld [vmem:[%s3560_s1 + $0x320] sm:$0xff]  ;;  %613 = vmatpush.msra.mxu2 %v183_v28 }
  0x1f   :  { %v247_v30 = vld [vmem:[%s3560_s1 + $0x700] sm:$0xff]  ;;  %592 = vmatpush.msra.mxu1 %v123_v29 }
  0x20   :  { %v51_v31 = vld [vmem:[%s3560_s1 + $0xe0] sm:$0xff]  ;;  %633 = vmatpush.msra.mxu3 %v247_v30 }
  0x21   :  { %v179_v32 = vld [vmem:[%s3560_s1 + $0x4e0] sm:$0xff]  ;;  %574 = vmatpush.msra.mxu0 %v51_v31 }
  0x22   :  { %v119_v33 = vld [vmem:[%s3560_s1 + $0x300] sm:$0xff]  ;;  %614 = vmatpush.msra.mxu2 %v179_v32 }
  0x23   :  { %v243_v34 = vld [vmem:[%s3560_s1 + $0x6e0] sm:$0xff]  ;;  %593 = vmatpush.msra.mxu1 %v119_v33 }
  0x24   :  { %v47_v35 = vld [vmem:[%s3560_s1 + $0xc0] sm:$0xff]  ;;  %634 = vmatpush.msra.mxu3 %v243_v34 }
  0x25   :  { %v175_v36 = vld [vmem:[%s3560_s1 + $0x4c0] sm:$0xff]  ;;  %575 = vmatpush.msra.mxu0 %v47_v35 }
  0x26   :  { %v115_v37 = vld [vmem:[%s3560_s1 + $0x2e0] sm:$0xff]  ;;  %615 = vmatpush.msra.mxu2 %v175_v36 }
  0x27   :  { %v239_v38 = vld [vmem:[%s3560_s1 + $0x6c0] sm:$0xff]  ;;  %594 = vmatpush.msra.mxu1 %v115_v37 }
  0x28   :  { %v43_v39 = vld [vmem:[%s3560_s1 + $0xa0] sm:$0xff]  ;;  %635 = vmatpush.msra.mxu3 %v239_v38 }
  0x29   :  { %v171_v40 = vld [vmem:[%s3560_s1 + $0x4a0] sm:$0xff]  ;;  %576 = vmatpush.msra.mxu0 %v43_v39 }
  0x2a   :  { %v111_v41 = vld [vmem:[%s3560_s1 + $0x2c0] sm:$0xff]  ;;  %616 = vmatpush.msra.mxu2 %v171_v40 }
  0x2b   :  { %v235_v42 = vld [vmem:[%s3560_s1 + $0x6a0] sm:$0xff]  ;;  %595 = vmatpush.msra.mxu1 %v111_v41 }
  0x2c   :  { %v39_v43 = vld [vmem:[%s3560_s1 + $0x80] sm:$0xff]  ;;  %636 = vmatpush.msra.mxu3 %v235_v42 }
  0x2d   :  { %v167_v44 = vld [vmem:[%s3560_s1 + $0x480] sm:$0xff]  ;;  %577 = vmatpush.msra.mxu0 %v39_v43 }
  0x2e   :  { %v107_v45 = vld [vmem:[%s3560_s1 + $0x2a0] sm:$0xff]  ;;  %617 = vmatpush.msra.mxu2 %v167_v44 }
  0x2f   :  { %v231_v46 = vld [vmem:[%s3560_s1 + $0x680] sm:$0xff]  ;;  %596 = vmatpush.msra.mxu1 %v107_v45 }
  0x30   :  { %v35_v47 = vld [vmem:[%s3560_s1 + $0x60] sm:$0xff]  ;;  %637 = vmatpush.msra.mxu3 %v231_v46 }
  0x31   :  { %v163_v48 = vld [vmem:[%s3560_s1 + $0x460] sm:$0xff]  ;;  %578 = vmatpush.msra.mxu0 %v35_v47 }
  0x32   :  { %v103_v49 = vld [vmem:[%s3560_s1 + $0x280] sm:$0xff]  ;;  %618 = vmatpush.msra.mxu2 %v163_v48 }
  0x33   :  { %v227_v50 = vld [vmem:[%s3560_s1 + $0x660] sm:$0xff]  ;;  %597 = vmatpush.msra.mxu1 %v103_v49 }
  0x34   :  { %v31_v51 = vld [vmem:[%s3560_s1 + $0x40] sm:$0xff]  ;;  %638 = vmatpush.msra.mxu3 %v227_v50 }
  0x35   :  { %v159_v52 = vld [vmem:[%s3560_s1 + $0x440] sm:$0xff]  ;;  %579 = vmatpush.msra.mxu0 %v31_v51 }
  0x36   :  { %v99_v53 = vld [vmem:[%s3560_s1 + $0x260] sm:$0xff]  ;;  %619 = vmatpush.msra.mxu2 %v159_v52 }
  0x37   :  { %v223_v54 = vld [vmem:[%s3560_s1 + $0x640] sm:$0xff]  ;;  %598 = vmatpush.msra.mxu1 %v99_v53 }
  0x38   :  { %v27_v55 = vld [vmem:[%s3560_s1 + $0x20] sm:$0xff]  ;;  %639 = vmatpush.msra.mxu3 %v223_v54 }
  0x39   :  { %v155_v56 = vld [vmem:[%s3560_s1 + $0x420] sm:$0xff]  ;;  %580 = vmatpush.msra.mxu0 %v27_v55 }
  0x3a   :  { %v95_v57 = vld [vmem:[%s3560_s1 + $0x240] sm:$0xff]  ;;  %620 = vmatpush.msra.mxu2 %v155_v56 }
  0x3b   :  { %v219_v58 = vld [vmem:[%s3560_s1 + $0x620] sm:$0xff]  ;;  %599 = vmatpush.msra.mxu1 %v95_v57 }
  0x3c   :  { %v23_v59 = vld [vmem:[%s3560_s1] sm:$0xff]  ;;  %640 = vmatpush.msra.mxu3 %v219_v58 }
  0x3d   :  { %v151_v60 = vld [vmem:[%s3560_s1 + $0x400] sm:$0xff]  ;;  %581 = vmatpush.msra.mxu0 %v23_v59 }
  0x3e   :  { %v339_v61 = vld [vmem:[%s3560_s1 + $0x9e0] sm:$0xff]  ;;  %621 = vmatpush.msra.mxu2 %v151_v60 }
  0x3f   :  { %v467_v62 = vld [vmem:[%s3560_s1 + $0xde0] sm:$0xff]  ;;  %646 = vmatpush.msrb.mxu0 %v339_v61 }
  0x40   :  { %v91_v63 = vld [vmem:[%s3560_s1 + $0x220] sm:$0xff]  ;;  %686 = vmatpush.msrb.mxu2 %v467_v62 }
  0x41   :  { %v215_v0 = vld [vmem:[%s3560_s1 + $0x600] sm:$0xff]  ;;  %600 = vmatpush.msra.mxu1 %v91_v63 }
  0x42   :  { %v335_v1 = vld [vmem:[%s3560_s1 + $0x9c0] sm:$0xff]  ;;  %641 = vmatpush.msra.mxu3 %v215_v0 }
  0x43   :  { %v463_v2 = vld [vmem:[%s3560_s1 + $0xdc0] sm:$0xff]  ;;  %647 = vmatpush.msrb.mxu0 %v335_v1 }
  0x44   :  { %v531_v3 = vld [vmem:[%s3560_s1 + $0xfe0] sm:$0xff]  ;;  %687 = vmatpush.msrb.mxu2 %v463_v2 }
  0x45   :  { %v87_v4 = vld [vmem:[%s3560_s1 + $0x200] sm:$0xff]  ;;  %706 = vmatpush.msrb.mxu3 %v531_v3  ;;  %v2055_v3 = vld.sshfl [vmem:[#allocation1 + $0x30] sm:$0xff pattern:$0x73625140] }
  0x46   :  { %v331_v5 = vld [vmem:[%s3560_s1 + $0x9a0] sm:$0xff]  ;;  %601 = vmatpush.msra.mxu1 %v87_v4  ;;  %v84_v4 = vld [vmem:[%s3560_s1 + $0x1e8] sm:$0xff] }
  0x47   :  { %v403_v6 = vld [vmem:[%s3560_s1 + $0xbe0] sm:$0xff]  ;;  %648 = vmatpush.msrb.mxu0 %v331_v5  ;;  %v212_v5 = vld [vmem:[%s3560_s1 + $0x5e8] sm:$0xff] }
  0x48   :  { %v459_v7 = vld [vmem:[%s3560_s1 + $0xda0] sm:$0xff]  ;;  %666 = vmatpush.msrb.mxu1 %v403_v6 }
  0x49   :  { %v527_v8 = vld [vmem:[%s3560_s1 + $0xfc0] sm:$0xff]  ;;  %688 = vmatpush.msrb.mxu2 %v459_v7 }
  0x4a   :  { %v327_v9 = vld [vmem:[%s3560_s1 + $0x980] sm:$0xff]  ;;  %707 = vmatpush.msrb.mxu3 %v527_v8 }
  0x4b   :  { %v399_v10 = vld [vmem:[%s3560_s1 + $0xbc0] sm:$0xff]  ;;  %649 = vmatpush.msrb.mxu0 %v327_v9  ;;  %v2072_v9 = vld.sshfl [vmem:[#allocation1 + $0x38] sm:$0xff pattern:$0x73625140] }
  0x4c   :  { %v455_v11 = vld [vmem:[%s3560_s1 + $0xd80] sm:$0xff]  ;;  %667 = vmatpush.msrb.mxu1 %v399_v10  ;;  %v80_v10 = vld [vmem:[%s3560_s1 + $0x1c8] sm:$0xff] }
  0x4d   :  { %v523_v12 = vld [vmem:[%s3560_s1 + $0xfa0] sm:$0xff]  ;;  %689 = vmatpush.msrb.mxu2 %v455_v11  ;;  %v208_v11 = vld [vmem:[%s3560_s1 + $0x5c8] sm:$0xff] }
  0x4e   :  { %v21_v13 = vld [vmem:[%s3559_s0] sm:$0xff]  ;;  %708 = vmatpush.msrb.mxu3 %v523_v12  ;;  %v276_v12 = vld [vmem:[%s3560_s1 + $0x7e8] sm:$0xff] }
  0x4f   :  { %v323_v14 = vld [vmem:[%s3560_s1 + $0x960] sm:$0xff]  ;;  %547 = vst [vmem:[#allocation1] ss:$4 sm:$0xff] %v21_v13 }
  0x50   :  { %v395_v15 = vld [vmem:[%s3560_s1 + $0xba0] sm:$0xff]  ;;  %650 = vmatpush.msrb.mxu0 %v323_v14  ;;  %v76_v14 = vld [vmem:[%s3560_s1 + $0x1a8] sm:$0xff] }
  0x51   :  { %v451_v16 = vld [vmem:[%s3560_s1 + $0xd60] sm:$0xff]  ;;  %668 = vmatpush.msrb.mxu1 %v395_v15  ;;  %v148_v15 = vld [vmem:[%s3560_s1 + $0x3e8] sm:$0xff] }
  0x52   :  { %v519_v17 = vld [vmem:[%s3560_s1 + $0xf80] sm:$0xff]  ;;  %690 = vmatpush.msrb.mxu2 %v451_v16  ;;  %v2094_v16 = vld.sshfl [vmem:[#allocation1 + $0x28] sm:$0xff pattern:$0x73625140] }
  0x53   :  { %v319_v18 = vld [vmem:[%s3560_s1 + $0x940] sm:$0xff]  ;;  %709 = vmatpush.msrb.mxu3 %v519_v17  ;;  %v204_v17 = vld [vmem:[%s3560_s1 + $0x5a8] sm:$0xff] }
  0x54   :  { %v391_v19 = vld [vmem:[%s3560_s1 + $0xb80] sm:$0xff]  ;;  %651 = vmatpush.msrb.mxu0 %v319_v18  ;;  %v272_v18 = vld [vmem:[%s3560_s1 + $0x7c8] sm:$0xff] }
  0x55   :  { %v447_v20 = vld [vmem:[%s3560_s1 + $0xd40] sm:$0xff]  ;;  %669 = vmatpush.msrb.mxu1 %v391_v19 }
  0x56   :  { %v515_v21 = vld [vmem:[%s3560_s1 + $0xf60] sm:$0xff]  ;;  %691 = vmatpush.msrb.mxu2 %v447_v20  ;;  %v1995_v47 = vld.sshfl [vmem:[#allocation1 + $0x10] sm:$0xff pattern:$0x73625140] }
  0x57   :  { %v315_v22 = vld [vmem:[%s3560_s1 + $0x920] sm:$0xff]  ;;  %710 = vmatpush.msrb.mxu3 %v515_v21  ;;  %622 = vmatmul.f32.vlgmr.msra.gmra.mxu2 %v1995_v47  ;;  %v2012_v53 = vld.sshfl [vmem:[#allocation1 + $0x18] sm:$0xff pattern:$0x73625140] }
  0x58   :  { %v387_v23 = vld [vmem:[%s3560_s1 + $0xb60] sm:$0xff]  ;;  %652 = vmatpush.msrb.mxu0 %v315_v22  ;;  %v2027_v58 = vld.sshfl [vmem:[#allocation1 + $0x8] sm:$0xff pattern:$0x73625140]  ;;  %642 = vmatmul.f32.vlgmr.msra.gmra.mxu3 %v2012_v53 }
  0x59   :  { %v443_v24 = vld [vmem:[%s3560_s1 + $0xd20] sm:$0xff]  ;;  %670 = vmatpush.msrb.mxu1 %v387_v23 }
  0x5a   :  { %v511_v25 = vld [vmem:[%s3560_s1 + $0xf40] sm:$0xff]  ;;  %692 = vmatpush.msrb.mxu2 %v443_v24  ;;  %602 = vmatmul.f32.vlgmr.msra.gmra.mxu1 %v2027_v58 }
  0x5b   :  { %v311_v27 = vld [vmem:[%s3560_s1 + $0x900] sm:$0xff]  ;;  %711 = vmatpush.msrb.mxu3 %v511_v25 }
  0x5c   :  { %v383_v28 = vld [vmem:[%s3560_s1 + $0xb40] sm:$0xff]  ;;  %653 = vmatpush.msrb.mxu0 %v311_v27 }
  0x5d   :  { %v439_v29 = vld [vmem:[%s3560_s1 + $0xd00] sm:$0xff]  ;;  %671 = vmatpush.msrb.mxu1 %v383_v28 }
  0x5e   :  { %v507_v30 = vld [vmem:[%s3560_s1 + $0xf20] sm:$0xff]  ;;  %693 = vmatpush.msrb.mxu2 %v439_v29 }
  0x5f   :  { %v307_v31 = vld [vmem:[%s3560_s1 + $0x8e0] sm:$0xff]  ;;  %712 = vmatpush.msrb.mxu3 %v507_v30 }
  0x60   :  { %v379_v32 = vld [vmem:[%s3560_s1 + $0xb20] sm:$0xff]  ;;  %654 = vmatpush.msrb.mxu0 %v307_v31 }
  0x61   :  { %v435_v33 = vld [vmem:[%s3560_s1 + $0xce0] sm:$0xff]  ;;  %672 = vmatpush.msrb.mxu1 %v379_v32 }
  0x62   :  { %v503_v34 = vld [vmem:[%s3560_s1 + $0xf00] sm:$0xff]  ;;  %694 = vmatpush.msrb.mxu2 %v435_v33 }
  0x63   :  { %v303_v35 = vld [vmem:[%s3560_s1 + $0x8c0] sm:$0xff]  ;;  %713 = vmatpush.msrb.mxu3 %v503_v34 }
  0x64   :  { %v375_v36 = vld [vmem:[%s3560_s1 + $0xb00] sm:$0xff]  ;;  %655 = vmatpush.msrb.mxu0 %v303_v35 }
  0x65   :  { %v431_v37 = vld [vmem:[%s3560_s1 + $0xcc0] sm:$0xff]  ;;  %673 = vmatpush.msrb.mxu1 %v375_v36 }
  0x66   :  { %v499_v38 = vld [vmem:[%s3560_s1 + $0xee0] sm:$0xff]  ;;  %695 = vmatpush.msrb.mxu2 %v431_v37 }
  0x67   :  { %v299_v39 = vld [vmem:[%s3560_s1 + $0x8a0] sm:$0xff]  ;;  %714 = vmatpush.msrb.mxu3 %v499_v38 }
  0x68   :  { %v371_v40 = vld [vmem:[%s3560_s1 + $0xae0] sm:$0xff]  ;;  %656 = vmatpush.msrb.mxu0 %v299_v39 }
  0x69   :  { %v427_v41 = vld [vmem:[%s3560_s1 + $0xca0] sm:$0xff]  ;;  %674 = vmatpush.msrb.mxu1 %v371_v40 }
  0x6a   :  { %v495_v42 = vld [vmem:[%s3560_s1 + $0xec0] sm:$0xff]  ;;  %696 = vmatpush.msrb.mxu2 %v427_v41 }
  0x6b   :  { %v295_v43 = vld [vmem:[%s3560_s1 + $0x880] sm:$0xff]  ;;  %715 = vmatpush.msrb.mxu3 %v495_v42 }
  0x6c   :  { %v367_v44 = vld [vmem:[%s3560_s1 + $0xac0] sm:$0xff]  ;;  %657 = vmatpush.msrb.mxu0 %v295_v43 }
  0x6d   :  { %v423_v45 = vld [vmem:[%s3560_s1 + $0xc80] sm:$0xff]  ;;  %675 = vmatpush.msrb.mxu1 %v367_v44 }
  0x6e   :  { %v491_v46 = vld [vmem:[%s3560_s1 + $0xea0] sm:$0xff]  ;;  %697 = vmatpush.msrb.mxu2 %v423_v45 }
  0x6f   :  { %v291_v48 = vld [vmem:[%s3560_s1 + $0x860] sm:$0xff]  ;;  %716 = vmatpush.msrb.mxu3 %v491_v46 }
  0x70   :  { %v363_v49 = vld [vmem:[%s3560_s1 + $0xaa0] sm:$0xff]  ;;  %658 = vmatpush.msrb.mxu0 %v291_v48 }
  0x71   :  { %v419_v50 = vld [vmem:[%s3560_s1 + $0xc60] sm:$0xff]  ;;  %676 = vmatpush.msrb.mxu1 %v363_v49 }
  0x72   :  { %v487_v51 = vld [vmem:[%s3560_s1 + $0xe80] sm:$0xff]  ;;  %698 = vmatpush.msrb.mxu2 %v419_v50 }
  0x73   :  { %v2009_v52 = vld.sshfl [vmem:[#allocation1] sm:$0xff pattern:$0x73625140]  ;;  %717 = vmatpush.msrb.mxu3 %v487_v51 }
  0x74   :  { %v287_v54 = vld [vmem:[%s3560_s1 + $0x840] sm:$0xff]  ;;  %582 = vmatmul.f32.vlgmr.msra.gmra.mxu0 %v2009_v52 }
  0x75   :  { %v359_v55 = vld [vmem:[%s3560_s1 + $0xa80] sm:$0xff]  ;;  %659 = vmatpush.msrb.mxu0 %v287_v54 }
  0x76   :  { %v415_v56 = vld [vmem:[%s3560_s1 + $0xc40] sm:$0xff]  ;;  %677 = vmatpush.msrb.mxu1 %v359_v55 }
  0x77   :  { %v483_v57 = vld [vmem:[%s3560_s1 + $0xe60] sm:$0xff]  ;;  %699 = vmatpush.msrb.mxu2 %v415_v56 }
  0x78   :  { %v283_v59 = vld [vmem:[%s3560_s1 + $0x820] sm:$0xff]  ;;  %718 = vmatpush.msrb.mxu3 %v483_v57 }
  0x79   :  { %v355_v60 = vld [vmem:[%s3560_s1 + $0xa60] sm:$0xff]  ;;  %660 = vmatpush.msrb.mxu0 %v283_v59 }
  0x7a   :  { %v411_v61 = vld [vmem:[%s3560_s1 + $0xc20] sm:$0xff]  ;;  %678 = vmatpush.msrb.mxu1 %v355_v60 }
  0x7b   :  { %v479_v62 = vld [vmem:[%s3560_s1 + $0xe40] sm:$0xff]  ;;  %700 = vmatpush.msrb.mxu2 %v411_v61 }
  0x7c   :  { %v279_v63 = vld [vmem:[%s3560_s1 + $0x800] sm:$0xff]  ;;  %719 = vmatpush.msrb.mxu3 %v479_v62 }
  0x7d   :  { %v351_v0 = vld [vmem:[%s3560_s1 + $0xa40] sm:$0xff]  ;;  %661 = vmatpush.msrb.mxu0 %v279_v63 }
  0x7e   :  { %v407_v1 = vld [vmem:[%s3560_s1 + $0xc00] sm:$0xff]  ;;  %679 = vmatpush.msrb.mxu1 %v351_v0 }
  0x7f   :  { %v475_v2 = vld [vmem:[%s3560_s1 + $0xe20] sm:$0xff]  ;;  %701 = vmatpush.msrb.mxu2 %v407_v1  ;;  %726 = vmatpush.msra.mxu0 %v84_v4 }
  0x80   :  { %v347_v6 = vld [vmem:[%s3560_s1 + $0xa20] sm:$0xff]  ;;  %720 = vmatpush.msrb.mxu3 %v475_v2  ;;  %702 = vmatmul.f32.vlgmr.msrb.gmra.mxu2 %v2055_v3 }
  0x81   :  { %v471_v7 = vld [vmem:[%s3560_s1 + $0xe00] sm:$0xff]  ;;  %766 = vmatpush.msra.mxu2 %v212_v5  ;;  %680 = vmatpush.msrb.mxu1 %v347_v6 }
  0x82   :  { %v2069_v8 = vld.sshfl [vmem:[#allocation1 + $0x20] sm:$0xff pattern:$0x73625140]  ;;  %721 = vmatpush.msrb.mxu3 %v471_v7  ;;  %727 = vmatpush.msra.mxu0 %v80_v10 }
  0x83   :  { %662 = vmatmul.f32.vlgmr.msrb.gmra.mxu0 %v2069_v8  ;;  %v343_v13 = vld [vmem:[%s3560_s1 + $0xa00] sm:$0xff]  ;;  %722 = vmatmul.f32.vlgmr.msrb.gmra.mxu3 %v2072_v9 }
  0x84   :  { %767 = vmatpush.msra.mxu2 %v208_v11  ;;  %786 = vmatpush.msra.mxu3 %v276_v12 }
  0x85   :  { %10 = vsyncpa [#allocation3], 0  ;;  %681 = vmatpush.msrb.mxu1 %v343_v13  ;;  %728 = vmatpush.msra.mxu0 %v76_v14  ;;  %v72_v19 = vld [vmem:[%s3560_s1 + $0x188] sm:$0xff]  ;;  %vm1206_vm0 = vcmask 1041408   ;;  %s1631_s16 = smov [#allocation2]   ;;  %s1567_s20 = sshll.u32 %s3564_s5, 4  ;;  %s1568_s20 = int_to_ptr.hbm [resolvable:$true] %s1567_s20 }
  0x86   :  { %v200_v20 = vld [vmem:[%s3560_s1 + $0x588] sm:$0xff]  ;;  %682 = vmatmul.f32.vlgmr.msrb.gmra.mxu1 %v2094_v16  ;;  %768 = vmatpush.msra.mxu2 %v204_v17  ;;  %s1565_s17 = sshll.u32 %s1631_s16, 4  ;;  %s1566_s17 = int_to_ptr.vmem [resolvable:$true] %s1565_s17 }
  0x87   :  { %v144_v21 = vld [vmem:[%s3560_s1 + $0x3c8] sm:$0xff]  ;;  %746 = vmatpush.msra.mxu1 %v148_v15  ;;  %787 = vmatpush.msra.mxu3 %v272_v18 }
  0x88   :  { %v268_v22 = vld [vmem:[%s3560_s1 + $0x7a8] sm:$0xff]  ;;  %729 = vmatpush.msra.mxu0 %v72_v19  ;;  %769 = vmatpush.msra.mxu2 %v200_v20 }
  0x89   :  { %v68_v23 = vld [vmem:[%s3560_s1 + $0x168] sm:$0xff]  ;;  %747 = vmatpush.msra.mxu1 %v144_v21  ;;  %788 = vmatpush.msra.mxu3 %v268_v22 }
  0x8a   :  { %v196_v24 = vld [vmem:[%s3560_s1 + $0x568] sm:$0xff]  ;;  %730 = vmatpush.msra.mxu0 %v68_v23 }
  0x8b   :  { %v140_v25 = vld [vmem:[%s3560_s1 + $0x3a8] sm:$0xff]  ;;  %770 = vmatpush.msra.mxu2 %v196_v24 }
  0x8c   :  { %v264_v26 = vld [vmem:[%s3560_s1 + $0x788] sm:$0xff]  ;;  %748 = vmatpush.msra.mxu1 %v140_v25 }
  0x8d   :  { %v64_v27 = vld [vmem:[%s3560_s1 + $0x148] sm:$0xff]  ;;  %789 = vmatpush.msra.mxu3 %v264_v26 }
  0x8e   :  { %v192_v28 = vld [vmem:[%s3560_s1 + $0x548] sm:$0xff]  ;;  %731 = vmatpush.msra.mxu0 %v64_v27 }
  0x8f   :  { %v136_v29 = vld [vmem:[%s3560_s1 + $0x388] sm:$0xff]  ;;  %771 = vmatpush.msra.mxu2 %v192_v28 }
  0x90   :  { %v260_v30 = vld [vmem:[%s3560_s1 + $0x768] sm:$0xff]  ;;  %749 = vmatpush.msra.mxu1 %v136_v29 }
  0x91   :  { %v60_v31 = vld [vmem:[%s3560_s1 + $0x128] sm:$0xff]  ;;  %790 = vmatpush.msra.mxu3 %v260_v30 }
  0x92   :  { %v188_v32 = vld [vmem:[%s3560_s1 + $0x528] sm:$0xff]  ;;  %732 = vmatpush.msra.mxu0 %v60_v31 }
  0x93   :  { %v132_v33 = vld [vmem:[%s3560_s1 + $0x368] sm:$0xff]  ;;  %772 = vmatpush.msra.mxu2 %v188_v32 }
  0x94   :  { %v256_v34 = vld [vmem:[%s3560_s1 + $0x748] sm:$0xff]  ;;  %750 = vmatpush.msra.mxu1 %v132_v33 }
  0x95   :  { %v56_v35 = vld [vmem:[%s3560_s1 + $0x108] sm:$0xff]  ;;  %791 = vmatpush.msra.mxu3 %v256_v34 }
  0x96   :  { %v184_v36 = vld [vmem:[%s3560_s1 + $0x508] sm:$0xff]  ;;  %733 = vmatpush.msra.mxu0 %v56_v35 }
  0x97   :  { %v128_v37 = vld [vmem:[%s3560_s1 + $0x348] sm:$0xff]  ;;  %773 = vmatpush.msra.mxu2 %v184_v36 }
  0x98   :  { %v252_v38 = vld [vmem:[%s3560_s1 + $0x728] sm:$0xff]  ;;  %751 = vmatpush.msra.mxu1 %v128_v37 }
  0x99   :  { %v52_v39 = vld [vmem:[%s3560_s1 + $0xe8] sm:$0xff]  ;;  %792 = vmatpush.msra.mxu3 %v252_v38 }
  0x9a   :  { %v180_v40 = vld [vmem:[%s3560_s1 + $0x4e8] sm:$0xff]  ;;  %734 = vmatpush.msra.mxu0 %v52_v39 }
  0x9b   :  { %v124_v41 = vld [vmem:[%s3560_s1 + $0x328] sm:$0xff]  ;;  %774 = vmatpush.msra.mxu2 %v180_v40 }
  0x9c   :  { %v248_v42 = vld [vmem:[%s3560_s1 + $0x708] sm:$0xff]  ;;  %752 = vmatpush.msra.mxu1 %v124_v41 }
  0x9d   :  { %v48_v43 = vld [vmem:[%s3560_s1 + $0xc8] sm:$0xff]  ;;  %793 = vmatpush.msra.mxu3 %v248_v42 }
  0x9e   :  { %v176_v44 = vld [vmem:[%s3560_s1 + $0x4c8] sm:$0xff]  ;;  %735 = vmatpush.msra.mxu0 %v48_v43 }
  0x9f   :  { %v120_v45 = vld [vmem:[%s3560_s1 + $0x308] sm:$0xff]  ;;  %775 = vmatpush.msra.mxu2 %v176_v44 }
  0xa0   :  { %v244_v46 = vld [vmem:[%s3560_s1 + $0x6e8] sm:$0xff]  ;;  %753 = vmatpush.msra.mxu1 %v120_v45 }
  0xa1   :  { %v44_v48 = vld [vmem:[%s3560_s1 + $0xa8] sm:$0xff]  ;;  %794 = vmatpush.msra.mxu3 %v244_v46 }
  0xa2   :  { %v172_v49 = vld [vmem:[%s3560_s1 + $0x4a8] sm:$0xff]  ;;  %736 = vmatpush.msra.mxu0 %v44_v48 }
  0xa3   :  { %v116_v50 = vld [vmem:[%s3560_s1 + $0x2e8] sm:$0xff]  ;;  %776 = vmatpush.msra.mxu2 %v172_v49 }
  0xa4   :  { %v240_v51 = vld [vmem:[%s3560_s1 + $0x6c8] sm:$0xff]  ;;  %754 = vmatpush.msra.mxu1 %v116_v50 }
  0xa5   :  { %v40_v54 = vld [vmem:[%s3560_s1 + $0x88] sm:$0xff]  ;;  %795 = vmatpush.msra.mxu3 %v240_v51 }
  0xa6   :  { %v168_v55 = vld [vmem:[%s3560_s1 + $0x488] sm:$0xff]  ;;  %737 = vmatpush.msra.mxu0 %v40_v54 }
  0xa7   :  { %v112_v56 = vld [vmem:[%s3560_s1 + $0x2c8] sm:$0xff]  ;;  %777 = vmatpush.msra.mxu2 %v168_v55 }
  0xa8   :  { %v236_v57 = vld [vmem:[%s3560_s1 + $0x6a8] sm:$0xff]  ;;  %755 = vmatpush.msra.mxu1 %v112_v56 }
  0xa9   :  { %v36_v59 = vld [vmem:[%s3560_s1 + $0x68] sm:$0xff]  ;;  %796 = vmatpush.msra.mxu3 %v236_v57 }
  0xaa   :  { %v164_v60 = vld [vmem:[%s3560_s1 + $0x468] sm:$0xff]  ;;  %738 = vmatpush.msra.mxu0 %v36_v59 }
  0xab   :  { %v108_v61 = vld [vmem:[%s3560_s1 + $0x2a8] sm:$0xff]  ;;  %778 = vmatpush.msra.mxu2 %v164_v60 }
  0xac   :  { %v232_v62 = vld [vmem:[%s3560_s1 + $0x688] sm:$0xff]  ;;  %756 = vmatpush.msra.mxu1 %v108_v61 }
  0xad   :  { %v32_v63 = vld [vmem:[%s3560_s1 + $0x48] sm:$0xff]  ;;  %797 = vmatpush.msra.mxu3 %v232_v62 }
  0xae   :  { %v160_v0 = vld [vmem:[%s3560_s1 + $0x448] sm:$0xff]  ;;  %739 = vmatpush.msra.mxu0 %v32_v63 }
  0xaf   :  { %v104_v1 = vld [vmem:[%s3560_s1 + $0x288] sm:$0xff]  ;;  %779 = vmatpush.msra.mxu2 %v160_v0 }
  0xb0   :  { %v228_v2 = vld [vmem:[%s3560_s1 + $0x668] sm:$0xff]  ;;  %757 = vmatpush.msra.mxu1 %v104_v1 }
  0xb1   :  { %v28_v4 = vld [vmem:[%s3560_s1 + $0x28] sm:$0xff]  ;;  %798 = vmatpush.msra.mxu3 %v228_v2 }
  0xb2   :  { %v156_v5 = vld [vmem:[%s3560_s1 + $0x428] sm:$0xff]  ;;  %740 = vmatpush.msra.mxu0 %v28_v4 }
  0xb3   :  { %v100_v6 = vld [vmem:[%s3560_s1 + $0x268] sm:$0xff]  ;;  %780 = vmatpush.msra.mxu2 %v156_v5 }
  0xb4   :  { %v224_v7 = vld [vmem:[%s3560_s1 + $0x648] sm:$0xff]  ;;  %758 = vmatpush.msra.mxu1 %v100_v6 }
  0xb5   :  { %v24_v10 = vld [vmem:[%s3560_s1 + $0x8] sm:$0xff]  ;;  %799 = vmatpush.msra.mxu3 %v224_v7 }
  0xb6   :  { %v152_v11 = vld [vmem:[%s3560_s1 + $0x408] sm:$0xff]  ;;  %741 = vmatpush.msra.mxu0 %v24_v10 }
  0xb7   :  { %v96_v12 = vld [vmem:[%s3560_s1 + $0x248] sm:$0xff]  ;;  %781 = vmatpush.msra.mxu2 %v152_v11  ;;  %742 = vmatmul.f32.vlgmr.msra.gmra.mxu0 %v2009_v52 }
  0xb8   :  { %v220_v13 = vld [vmem:[%s3560_s1 + $0x628] sm:$0xff]  ;;  %759 = vmatpush.msra.mxu1 %v96_v12  ;;  %782 = vmatmul.f32.vlgmr.msra.gmra.mxu2 %v1995_v47 }
  0xb9   :  { %v340_v14 = vld [vmem:[%s3560_s1 + $0x9e8] sm:$0xff]  ;;  %800 = vmatpush.msra.mxu3 %v220_v13 }
  0xba   :  { %v468_v15 = vld [vmem:[%s3560_s1 + $0xde8] sm:$0xff]  ;;  %806 = vmatpush.msrb.mxu0 %v340_v14 }
  0xbb   :  { %v92_v17 = vld [vmem:[%s3560_s1 + $0x228] sm:$0xff]  ;;  %846 = vmatpush.msrb.mxu2 %v468_v15 }
  0xbc   :  { %v216_v18 = vld [vmem:[%s3560_s1 + $0x608] sm:$0xff]  ;;  %760 = vmatpush.msra.mxu1 %v92_v17 }
  0xbd   :  { %v336_v19 = vld [vmem:[%s3560_s1 + $0x9c8] sm:$0xff]  ;;  %801 = vmatpush.msra.mxu3 %v216_v18 }
  0xbe   :  { %v464_v20 = vld [vmem:[%s3560_s1 + $0xdc8] sm:$0xff]  ;;  %807 = vmatpush.msrb.mxu0 %v336_v19  ;;  %802 = vmatmul.f32.vlgmr.msra.gmra.mxu3 %v2012_v53 }
  0xbf   :  { %v532_v21 = vld [vmem:[%s3560_s1 + $0xfe8] sm:$0xff]  ;;  %847 = vmatpush.msrb.mxu2 %v464_v20  ;;  %v213_v20 = vld [vmem:[%s3560_s1 + $0x5f0] sm:$0xff] }
  0xc0   :  { %v88_v22 = vld [vmem:[%s3560_s1 + $0x208] sm:$0xff]  ;;  %866 = vmatpush.msrb.mxu3 %v532_v21 }
  0xc1   :  { %v332_v23 = vld [vmem:[%s3560_s1 + $0x9a8] sm:$0xff]  ;;  %761 = vmatpush.msra.mxu1 %v88_v22 }
  0xc2   :  { %v404_v24 = vld [vmem:[%s3560_s1 + $0xbe8] sm:$0xff]  ;;  %808 = vmatpush.msrb.mxu0 %v332_v23  ;;  %762 = vmatmul.f32.vlgmr.msra.gmra.mxu1 %v2027_v58  ;;  %v85_v58 = vld [vmem:[%s3560_s1 + $0x1f0] sm:$0xff] }
  0xc3   :  { %v460_v25 = vld [vmem:[%s3560_s1 + $0xda8] sm:$0xff]  ;;  %826 = vmatpush.msrb.mxu1 %v404_v24  ;;  %v81_v23 = vld [vmem:[%s3560_s1 + $0x1d0] sm:$0xff] }
  0xc4   :  { %v528_v26 = vld [vmem:[%s3560_s1 + $0xfc8] sm:$0xff]  ;;  %848 = vmatpush.msrb.mxu2 %v460_v25  ;;  %v209_v24 = vld [vmem:[%s3560_s1 + $0x5d0] sm:$0xff] }
  0xc5   :  { %v328_v27 = vld [vmem:[%s3560_s1 + $0x988] sm:$0xff]  ;;  %867 = vmatpush.msrb.mxu3 %v528_v26  ;;  %v277_v25 = vld [vmem:[%s3560_s1 + $0x7f0] sm:$0xff] }
  0xc6   :  { %v400_v28 = vld [vmem:[%s3560_s1 + $0xbc8] sm:$0xff]  ;;  %809 = vmatpush.msrb.mxu0 %v328_v27  ;;  %v77_v26 = vld [vmem:[%s3560_s1 + $0x1b0] sm:$0xff] }
  0xc7   :  { %v456_v29 = vld [vmem:[%s3560_s1 + $0xd88] sm:$0xff]  ;;  %827 = vmatpush.msrb.mxu1 %v400_v28  ;;  %v205_v27 = vld [vmem:[%s3560_s1 + $0x5b0] sm:$0xff] }
  0xc8   :  { %v524_v30 = vld [vmem:[%s3560_s1 + $0xfa8] sm:$0xff]  ;;  %849 = vmatpush.msrb.mxu2 %v456_v29  ;;  %v273_v28 = vld [vmem:[%s3560_s1 + $0x7d0] sm:$0xff] }
  0xc9   :  { %v324_v31 = vld [vmem:[%s3560_s1 + $0x968] sm:$0xff]  ;;  %868 = vmatpush.msrb.mxu3 %v524_v30  ;;  %v201_v29 = vld [vmem:[%s3560_s1 + $0x590] sm:$0xff] }
  0xca   :  { %v396_v32 = vld [vmem:[%s3560_s1 + $0xba8] sm:$0xff]  ;;  %810 = vmatpush.msrb.mxu0 %v324_v31  ;;  %v145_v30 = vld [vmem:[%s3560_s1 + $0x3d0] sm:$0xff] }
  0xcb   :  { %v452_v33 = vld [vmem:[%s3560_s1 + $0xd68] sm:$0xff]  ;;  %828 = vmatpush.msrb.mxu1 %v396_v32  ;;  %v269_v31 = vld [vmem:[%s3560_s1 + $0x7b0] sm:$0xff] }
  0xcc   :  { %v520_v34 = vld [vmem:[%s3560_s1 + $0xf88] sm:$0xff]  ;;  %850 = vmatpush.msrb.mxu2 %v452_v33  ;;  %v69_v32 = vld [vmem:[%s3560_s1 + $0x170] sm:$0xff] }
  0xcd   :  { %v320_v35 = vld [vmem:[%s3560_s1 + $0x948] sm:$0xff]  ;;  %869 = vmatpush.msrb.mxu3 %v520_v34  ;;  %v197_v33 = vld [vmem:[%s3560_s1 + $0x570] sm:$0xff] }
  0xce   :  { %v392_v36 = vld [vmem:[%s3560_s1 + $0xb88] sm:$0xff]  ;;  %811 = vmatpush.msrb.mxu0 %v320_v35  ;;  %v265_v34 = vld [vmem:[%s3560_s1 + $0x790] sm:$0xff] }
  0xcf   :  { %v448_v37 = vld [vmem:[%s3560_s1 + $0xd48] sm:$0xff]  ;;  %829 = vmatpush.msrb.mxu1 %v392_v36  ;;  %v65_v35 = vld [vmem:[%s3560_s1 + $0x150] sm:$0xff] }
  0xd0   :  { %v516_v38 = vld [vmem:[%s3560_s1 + $0xf68] sm:$0xff]  ;;  %851 = vmatpush.msrb.mxu2 %v448_v37  ;;  %v193_v36 = vld [vmem:[%s3560_s1 + $0x550] sm:$0xff] }
  0xd1   :  { %v316_v39 = vld [vmem:[%s3560_s1 + $0x928] sm:$0xff]  ;;  %870 = vmatpush.msrb.mxu3 %v516_v38  ;;  %v137_v37 = vld [vmem:[%s3560_s1 + $0x390] sm:$0xff] }
  0xd2   :  { %v388_v40 = vld [vmem:[%s3560_s1 + $0xb68] sm:$0xff]  ;;  %812 = vmatpush.msrb.mxu0 %v316_v39  ;;  %v261_v38 = vld [vmem:[%s3560_s1 + $0x770] sm:$0xff] }
  0xd3   :  { %v444_v41 = vld [vmem:[%s3560_s1 + $0xd28] sm:$0xff]  ;;  %830 = vmatpush.msrb.mxu1 %v388_v40  ;;  %v61_v39 = vld [vmem:[%s3560_s1 + $0x130] sm:$0xff] }
  0xd4   :  { %v512_v42 = vld [vmem:[%s3560_s1 + $0xf48] sm:$0xff]  ;;  %852 = vmatpush.msrb.mxu2 %v444_v41  ;;  %v189_v40 = vld [vmem:[%s3560_s1 + $0x530] sm:$0xff] }
  0xd5   :  { %v312_v43 = vld [vmem:[%s3560_s1 + $0x908] sm:$0xff]  ;;  %871 = vmatpush.msrb.mxu3 %v512_v42  ;;  %v133_v41 = vld [vmem:[%s3560_s1 + $0x370] sm:$0xff] }
  0xd6   :  { %v384_v44 = vld [vmem:[%s3560_s1 + $0xb48] sm:$0xff]  ;;  %813 = vmatpush.msrb.mxu0 %v312_v43  ;;  %v257_v42 = vld [vmem:[%s3560_s1 + $0x750] sm:$0xff] }
  0xd7   :  { %v440_v45 = vld [vmem:[%s3560_s1 + $0xd08] sm:$0xff]  ;;  %831 = vmatpush.msrb.mxu1 %v384_v44  ;;  %v57_v43 = vld [vmem:[%s3560_s1 + $0x110] sm:$0xff] }
  0xd8   :  { %v508_v46 = vld [vmem:[%s3560_s1 + $0xf28] sm:$0xff]  ;;  %853 = vmatpush.msrb.mxu2 %v440_v45  ;;  %v185_v44 = vld [vmem:[%s3560_s1 + $0x510] sm:$0xff] }
  0xd9   :  { %v308_v48 = vld [vmem:[%s3560_s1 + $0x8e8] sm:$0xff]  ;;  %872 = vmatpush.msrb.mxu3 %v508_v46  ;;  %v129_v45 = vld [vmem:[%s3560_s1 + $0x350] sm:$0xff] }
  0xda   :  { %v380_v49 = vld [vmem:[%s3560_s1 + $0xb28] sm:$0xff]  ;;  %814 = vmatpush.msrb.mxu0 %v308_v48  ;;  %v253_v46 = vld [vmem:[%s3560_s1 + $0x730] sm:$0xff] }
  0xdb   :  { %v436_v50 = vld [vmem:[%s3560_s1 + $0xce8] sm:$0xff]  ;;  %832 = vmatpush.msrb.mxu1 %v380_v49  ;;  %v53_v48 = vld [vmem:[%s3560_s1 + $0xf0] sm:$0xff] }
  0xdc   :  { %v504_v51 = vld [vmem:[%s3560_s1 + $0xf08] sm:$0xff]  ;;  %854 = vmatpush.msrb.mxu2 %v436_v50  ;;  %v181_v49 = vld [vmem:[%s3560_s1 + $0x4f0] sm:$0xff] }
  0xdd   :  { %v304_v54 = vld [vmem:[%s3560_s1 + $0x8c8] sm:$0xff]  ;;  %873 = vmatpush.msrb.mxu3 %v504_v51  ;;  %v125_v50 = vld [vmem:[%s3560_s1 + $0x330] sm:$0xff] }
  0xde   :  { %v376_v55 = vld [vmem:[%s3560_s1 + $0xb08] sm:$0xff]  ;;  %815 = vmatpush.msrb.mxu0 %v304_v54  ;;  %v249_v51 = vld [vmem:[%s3560_s1 + $0x710] sm:$0xff] }
  0xdf   :  { %v432_v56 = vld [vmem:[%s3560_s1 + $0xcc8] sm:$0xff]  ;;  %833 = vmatpush.msrb.mxu1 %v376_v55  ;;  %v49_v54 = vld [vmem:[%s3560_s1 + $0xd0] sm:$0xff] }
  0xe0   :  { %v500_v57 = vld [vmem:[%s3560_s1 + $0xee8] sm:$0xff]  ;;  %855 = vmatpush.msrb.mxu2 %v432_v56  ;;  %v177_v55 = vld [vmem:[%s3560_s1 + $0x4d0] sm:$0xff] }
  0xe1   :  { %v300_v59 = vld [vmem:[%s3560_s1 + $0x8a8] sm:$0xff]  ;;  %874 = vmatpush.msrb.mxu3 %v500_v57  ;;  %v121_v56 = vld [vmem:[%s3560_s1 + $0x310] sm:$0xff] }
  0xe2   :  { %v372_v60 = vld [vmem:[%s3560_s1 + $0xae8] sm:$0xff]  ;;  %816 = vmatpush.msrb.mxu0 %v300_v59  ;;  %v245_v57 = vld [vmem:[%s3560_s1 + $0x6f0] sm:$0xff] }
  0xe3   :  { %v428_v61 = vld [vmem:[%s3560_s1 + $0xca8] sm:$0xff]  ;;  %834 = vmatpush.msrb.mxu1 %v372_v60  ;;  %v45_v59 = vld [vmem:[%s3560_s1 + $0xb0] sm:$0xff] }
  0xe4   :  { %v496_v62 = vld [vmem:[%s3560_s1 + $0xec8] sm:$0xff]  ;;  %856 = vmatpush.msrb.mxu2 %v428_v61  ;;  %v173_v60 = vld [vmem:[%s3560_s1 + $0x4b0] sm:$0xff] }
  0xe5   :  { %v296_v63 = vld [vmem:[%s3560_s1 + $0x888] sm:$0xff]  ;;  %875 = vmatpush.msrb.mxu3 %v496_v62  ;;  %v117_v61 = vld [vmem:[%s3560_s1 + $0x2f0] sm:$0xff] }
  0xe6   :  { %v368_v0 = vld [vmem:[%s3560_s1 + $0xac8] sm:$0xff]  ;;  %817 = vmatpush.msrb.mxu0 %v296_v63  ;;  %v241_v62 = vld [vmem:[%s3560_s1 + $0x6d0] sm:$0xff] }
  0xe7   :  { %v424_v1 = vld [vmem:[%s3560_s1 + $0xc88] sm:$0xff]  ;;  %835 = vmatpush.msrb.mxu1 %v368_v0  ;;  %v41_v63 = vld [vmem:[%s3560_s1 + $0x90] sm:$0xff] }
  0xe8   :  { %v492_v2 = vld [vmem:[%s3560_s1 + $0xea8] sm:$0xff]  ;;  %857 = vmatpush.msrb.mxu2 %v424_v1  ;;  %v169_v0 = vld [vmem:[%s3560_s1 + $0x490] sm:$0xff] }
  0xe9   :  { %v292_v4 = vld [vmem:[%s3560_s1 + $0x868] sm:$0xff]  ;;  %876 = vmatpush.msrb.mxu3 %v492_v2  ;;  %v113_v1 = vld [vmem:[%s3560_s1 + $0x2d0] sm:$0xff] }
  0xea   :  { %v364_v5 = vld [vmem:[%s3560_s1 + $0xaa8] sm:$0xff]  ;;  %818 = vmatpush.msrb.mxu0 %v292_v4  ;;  %v237_v2 = vld [vmem:[%s3560_s1 + $0x6b0] sm:$0xff] }
  0xeb   :  { %v420_v6 = vld [vmem:[%s3560_s1 + $0xc68] sm:$0xff]  ;;  %836 = vmatpush.msrb.mxu1 %v364_v5  ;;  %v37_v4 = vld [vmem:[%s3560_s1 + $0x70] sm:$0xff] }
  0xec   :  { %v488_v7 = vld [vmem:[%s3560_s1 + $0xe88] sm:$0xff]  ;;  %858 = vmatpush.msrb.mxu2 %v420_v6  ;;  %v165_v5 = vld [vmem:[%s3560_s1 + $0x470] sm:$0xff] }
  0xed   :  { %v288_v10 = vld [vmem:[%s3560_s1 + $0x848] sm:$0xff]  ;;  %877 = vmatpush.msrb.mxu3 %v488_v7  ;;  %v109_v6 = vld [vmem:[%s3560_s1 + $0x2b0] sm:$0xff] }
  0xee   :  { %v360_v11 = vld [vmem:[%s3560_s1 + $0xa88] sm:$0xff]  ;;  %819 = vmatpush.msrb.mxu0 %v288_v10  ;;  %v233_v7 = vld [vmem:[%s3560_s1 + $0x690] sm:$0xff] }
  0xef   :  { %v416_v12 = vld [vmem:[%s3560_s1 + $0xc48] sm:$0xff]  ;;  %837 = vmatpush.msrb.mxu1 %v360_v11  ;;  %v33_v10 = vld [vmem:[%s3560_s1 + $0x50] sm:$0xff] }
  0xf0   :  { %v484_v47 = vld [vmem:[%s3560_s1 + $0xe68] sm:$0xff]  ;;  %859 = vmatpush.msrb.mxu2 %v416_v12  ;;  %v161_v11 = vld [vmem:[%s3560_s1 + $0x450] sm:$0xff] }
  0xf1   :  { %v284_v13 = vld [vmem:[%s3560_s1 + $0x828] sm:$0xff]  ;;  %878 = vmatpush.msrb.mxu3 %v484_v47  ;;  %v105_v12 = vld [vmem:[%s3560_s1 + $0x290] sm:$0xff] }
  0xf2   :  { %v356_v14 = vld [vmem:[%s3560_s1 + $0xa68] sm:$0xff]  ;;  %820 = vmatpush.msrb.mxu0 %v284_v13  ;;  %v229_v47 = vld [vmem:[%s3560_s1 + $0x670] sm:$0xff] }
  0xf3   :  { %v412_v52 = vld [vmem:[%s3560_s1 + $0xc28] sm:$0xff]  ;;  %838 = vmatpush.msrb.mxu1 %v356_v14  ;;  %v29_v13 = vld [vmem:[%s3560_s1 + $0x30] sm:$0xff] }
  0xf4   :  { %v480_v15 = vld [vmem:[%s3560_s1 + $0xe48] sm:$0xff]  ;;  %860 = vmatpush.msrb.mxu2 %v412_v52  ;;  %v157_v14 = vld [vmem:[%s3560_s1 + $0x430] sm:$0xff] }
  0xf5   :  { %v280_v53 = vld [vmem:[%s3560_s1 + $0x808] sm:$0xff]  ;;  %879 = vmatpush.msrb.mxu3 %v480_v15  ;;  %v101_v52 = vld [vmem:[%s3560_s1 + $0x270] sm:$0xff] }
  0xf6   :  { %v352_v17 = vld [vmem:[%s3560_s1 + $0xa48] sm:$0xff]  ;;  %821 = vmatpush.msrb.mxu0 %v280_v53  ;;  %v225_v15 = vld [vmem:[%s3560_s1 + $0x650] sm:$0xff] }
  0xf7   :  { %v408_v18 = vld [vmem:[%s3560_s1 + $0xc08] sm:$0xff]  ;;  %839 = vmatpush.msrb.mxu1 %v352_v17  ;;  %822 = vmatmul.f32.vlgmr.msrb.gmra.mxu0 %v2069_v8  ;;  %v149_v8 = vld [vmem:[%s3560_s1 + $0x3f0] sm:$0xff] }
  0xf8   :  { %v476_v19 = vld [vmem:[%s3560_s1 + $0xe28] sm:$0xff]  ;;  %861 = vmatpush.msrb.mxu2 %v408_v18  ;;  %886 = vmatpush.msra.mxu0 %v85_v58  ;;  %v25_v53 = vld [vmem:[%s3560_s1 + $0x10] sm:$0xff] }
  0xf9   :  { %v348_v21 = vld [vmem:[%s3560_s1 + $0xa28] sm:$0xff]  ;;  %880 = vmatpush.msrb.mxu3 %v476_v19  ;;  %862 = vmatmul.f32.vlgmr.msrb.gmra.mxu2 %v2055_v3  ;;  %v153_v17 = vld [vmem:[%s3560_s1 + $0x410] sm:$0xff] }
  0xfa   :  { %v472_v22 = vld [vmem:[%s3560_s1 + $0xe08] sm:$0xff]  ;;  %926 = vmatpush.msra.mxu2 %v213_v20  ;;  %840 = vmatpush.msrb.mxu1 %v348_v21  ;;  %v97_v18 = vld [vmem:[%s3560_s1 + $0x250] sm:$0xff] }
  0xfb   :  { %881 = vmatpush.msrb.mxu3 %v472_v22  ;;  %v344_v3 = vld [vmem:[%s3560_s1 + $0xa08] sm:$0xff]  ;;  %887 = vmatpush.msra.mxu0 %v81_v23  ;;  %v221_v19 = vld [vmem:[%s3560_s1 + $0x630] sm:$0xff] }
  0xfc   :  { %882 = vmatmul.f32.vlgmr.msrb.gmra.mxu3 %v2072_v9  ;;  %927 = vmatpush.msra.mxu2 %v209_v24  ;;  %v73_v9 = vld [vmem:[%s3560_s1 + $0x190] sm:$0xff] }
  0xfd   :  { %946 = vmatpush.msra.mxu3 %v277_v25  ;;  %841 = vmatpush.msrb.mxu1 %v344_v3  ;;  %v341_v58 = vld [vmem:[%s3560_s1 + $0x9f0] sm:$0xff] }
  0xfe   :  { %888 = vmatpush.msra.mxu0 %v77_v26  ;;  %842 = vmatmul.f32.vlgmr.msrb.gmra.mxu1 %v2094_v16  ;;  %v141_v16 = vld [vmem:[%s3560_s1 + $0x3b0] sm:$0xff] }
  0xff   :  { %928 = vmatpush.msra.mxu2 %v205_v27  ;;  %906 = vmatpush.msra.mxu1 %v149_v8  ;;  %v469_v20 = vld [vmem:[%s3560_s1 + $0xdf0] sm:$0xff] }
 0x100   :  { %947 = vmatpush.msra.mxu3 %v273_v28  ;;  %889 = vmatpush.msra.mxu0 %v73_v9  ;;  %v93_v21 = vld [vmem:[%s3560_s1 + $0x230] sm:$0xff] }
 0x101   :  { %929 = vmatpush.msra.mxu2 %v201_v29  ;;  %907 = vmatpush.msra.mxu1 %v145_v30  ;;  %v217_v22 = vld [vmem:[%s3560_s1 + $0x610] sm:$0xff] }
 0x102   :  { %948 = vmatpush.msra.mxu3 %v269_v31  ;;  %890 = vmatpush.msra.mxu0 %v69_v32  ;;  %v337_v23 = vld [vmem:[%s3560_s1 + $0x9d0] sm:$0xff] }
 0x103   :  { %930 = vmatpush.msra.mxu2 %v197_v33  ;;  %908 = vmatpush.msra.mxu1 %v141_v16  ;;  %v465_v24 = vld [vmem:[%s3560_s1 + $0xdd0] sm:$0xff] }
 0x104   :  { %949 = vmatpush.msra.mxu3 %v265_v34  ;;  %891 = vmatpush.msra.mxu0 %v65_v35  ;;  %v533_v25 = vld [vmem:[%s3560_s1 + $0xff0] sm:$0xff] }
 0x105   :  { %931 = vmatpush.msra.mxu2 %v193_v36  ;;  %909 = vmatpush.msra.mxu1 %v137_v37  ;;  %v89_v3 = vld [vmem:[%s3560_s1 + $0x210] sm:$0xff] }
 0x106   :  { %950 = vmatpush.msra.mxu3 %v261_v38  ;;  %892 = vmatpush.msra.mxu0 %v61_v39  ;;  %v333_v26 = vld [vmem:[%s3560_s1 + $0x9b0] sm:$0xff] }
 0x107   :  { %932 = vmatpush.msra.mxu2 %v189_v40  ;;  %910 = vmatpush.msra.mxu1 %v133_v41  ;;  %v405_v27 = vld [vmem:[%s3560_s1 + $0xbf0] sm:$0xff] }
 0x108   :  { %951 = vmatpush.msra.mxu3 %v257_v42  ;;  %893 = vmatpush.msra.mxu0 %v57_v43  ;;  %v461_v8 = vld [vmem:[%s3560_s1 + $0xdb0] sm:$0xff] }
 0x109   :  { %933 = vmatpush.msra.mxu2 %v185_v44  ;;  %911 = vmatpush.msra.mxu1 %v129_v45  ;;  %v529_v28 = vld [vmem:[%s3560_s1 + $0xfd0] sm:$0xff] }
 0x10a   :  { %952 = vmatpush.msra.mxu3 %v253_v46  ;;  %894 = vmatpush.msra.mxu0 %v53_v48  ;;  %v329_v9 = vld [vmem:[%s3560_s1 + $0x990] sm:$0xff] }
 0x10b   :  { %934 = vmatpush.msra.mxu2 %v181_v49  ;;  %912 = vmatpush.msra.mxu1 %v125_v50  ;;  %v401_v29 = vld [vmem:[%s3560_s1 + $0xbd0] sm:$0xff] }
 0x10c   :  { %953 = vmatpush.msra.mxu3 %v249_v51  ;;  %895 = vmatpush.msra.mxu0 %v49_v54  ;;  %v457_v30 = vld [vmem:[%s3560_s1 + $0xd90] sm:$0xff] }
 0x10d   :  { %935 = vmatpush.msra.mxu2 %v177_v55  ;;  %913 = vmatpush.msra.mxu1 %v121_v56  ;;  %v525_v31 = vld [vmem:[%s3560_s1 + $0xfb0] sm:$0xff] }
 0x10e   :  { %954 = vmatpush.msra.mxu3 %v245_v57  ;;  %896 = vmatpush.msra.mxu0 %v45_v59  ;;  %v325_v32 = vld [vmem:[%s3560_s1 + $0x970] sm:$0xff]  ;;  %v583_v59 = vpop.f32.mrf.mxu0 }
 0x10f   :  { %936 = vmatpush.msra.mxu2 %v173_v60  ;;  %914 = vmatpush.msra.mxu1 %v117_v61  ;;  %v397_v33 = vld [vmem:[%s3560_s1 + $0xbb0] sm:$0xff] }
 0x110   :  { %955 = vmatpush.msra.mxu3 %v241_v62  ;;  %897 = vmatpush.msra.mxu0 %v41_v63  ;;  %v453_v16 = vld [vmem:[%s3560_s1 + $0xd70] sm:$0xff] }
 0x111   :  { %937 = vmatpush.msra.mxu2 %v169_v0  ;;  %915 = vmatpush.msra.mxu1 %v113_v1  ;;  %v521_v34 = vld [vmem:[%s3560_s1 + $0xf90] sm:$0xff] }
 0x112   :  { %956 = vmatpush.msra.mxu3 %v237_v2  ;;  %898 = vmatpush.msra.mxu0 %v37_v4  ;;  %v321_v35 = vld [vmem:[%s3560_s1 + $0x950] sm:$0xff]  ;;  %v603_v4 = vpop.f32.mrf.mxu1 }
 0x113   :  { %938 = vmatpush.msra.mxu2 %v165_v5  ;;  %916 = vmatpush.msra.mxu1 %v109_v6  ;;  %v393_v36 = vld [vmem:[%s3560_s1 + $0xb90] sm:$0xff] }
 0x114   :  { %957 = vmatpush.msra.mxu3 %v233_v7  ;;  %899 = vmatpush.msra.mxu0 %v33_v10  ;;  %v449_v37 = vld [vmem:[%s3560_s1 + $0xd50] sm:$0xff]  ;;  %v623_v10 = vpop.f32.mrf.mxu2 }
 0x115   :  { %939 = vmatpush.msra.mxu2 %v161_v11  ;;  %917 = vmatpush.msra.mxu1 %v105_v12  ;;  %v517_v38 = vld [vmem:[%s3560_s1 + $0xf70] sm:$0xff] }
 0x116   :  { %958 = vmatpush.msra.mxu3 %v229_v47  ;;  %900 = vmatpush.msra.mxu0 %v29_v13  ;;  %v317_v39 = vld [vmem:[%s3560_s1 + $0x930] sm:$0xff] }
 0x117   :  { %940 = vmatpush.msra.mxu2 %v157_v14  ;;  %918 = vmatpush.msra.mxu1 %v101_v52  ;;  %v389_v40 = vld [vmem:[%s3560_s1 + $0xb70] sm:$0xff]  ;;  %v1630_v14 = vmov 2.0  }
 0x118   :  { %959 = vmatpush.msra.mxu3 %v225_v15  ;;  %901 = vmatpush.msra.mxu0 %v25_v53  ;;  %v2732_v41 = vld [vmem:[%s3561_s2] ss:$8 sm:$0xf]  ;;  %1583 = vrcp.f32 %v1630_v14  ;;  %v643_v53 = vpop.f32.mrf.mxu3 }
 0x119   :  { %941 = vmatpush.msra.mxu2 %v153_v17  ;;  %919 = vmatpush.msra.mxu1 %v97_v18  ;;  %v445_v42 = vld [vmem:[%s3560_s1 + $0xd30] sm:$0xff]  ;;  %v537_v49 = vperm.slane %v2732_v41, 0 }
 0x11a   :  { %960 = vmatpush.msra.mxu3 %v221_v19  ;;  %966 = vmatpush.msrb.mxu0 %v341_v58  ;;  %v513_v43 = vld [vmem:[%s3560_s1 + $0xf50] sm:$0xff] }
 0x11b   :  { %1006 = vmatpush.msrb.mxu2 %v469_v20  ;;  %920 = vmatpush.msra.mxu1 %v93_v21  ;;  %v313_v44 = vld [vmem:[%s3560_s1 + $0x910] sm:$0xff]  ;;  %v584_v62 = vadd.f32 %v583_v59, %v537_v49  ;;  %v210_v49 = vld [vmem:[%s3560_s1 + $0x5d8] sm:$0xff] }
 0x11c   :  { %961 = vmatpush.msra.mxu3 %v217_v22  ;;  %967 = vmatpush.msrb.mxu0 %v337_v23  ;;  %v385_v45 = vld [vmem:[%s3560_s1 + $0xb50] sm:$0xff]  ;;  %v663_v22 = vpop.f32.mrf.mxu0  ;;  %v2825_v23 = vld.sshfl [vmem:[#allocation1] sm:$0xff pattern:$0x73625140]  ;;  %v206_v59 = vld [vmem:[%s3560_s1 + $0x5b8] sm:$0xff] }
 0x11d   :  { %1007 = vmatpush.msrb.mxu2 %v465_v24  ;;  %921 = vmatpush.msra.mxu1 %v89_v3  ;;  %v441_v46 = vld [vmem:[%s3560_s1 + $0xd10] sm:$0xff]  ;;  %v604_v7 = vadd.f32 %v603_v4, %v584_v62  ;;  %v274_v62 = vld [vmem:[%s3560_s1 + $0x7d8] sm:$0xff]  ;;  %v2920_v4 = vld.sshfl [vmem:[#allocation1 + $0x28] sm:$0xff pattern:$0x73625140] }
 0x11e   :  { %1026 = vmatpush.msrb.mxu3 %v533_v25  ;;  %968 = vmatpush.msrb.mxu0 %v333_v26  ;;  %v509_v48 = vld [vmem:[%s3560_s1 + $0xf30] sm:$0xff]  ;;  %v2831_v3 = vpop.eup %1583  ;;  %v2833_v26 = vld.sshfl [vmem:[#allocation1 + $0x18] sm:$0xff pattern:$0x73625140] }
 0x11f   :  { %986 = vmatpush.msrb.mxu1 %v405_v27  ;;  %1008 = vmatpush.msrb.mxu2 %v461_v8  ;;  %v309_v50 = vld [vmem:[%s3560_s1 + $0x8f0] sm:$0xff]  ;;  %v624_v13 = vadd.f32 %v623_v10, %v604_v7  ;;  %v70_v7 = vld [vmem:[%s3560_s1 + $0x178] sm:$0xff]  ;;  %vm1240_vm1 = vweird.f32 %v2831_v3 }
 0x120   :  { %1027 = vmatpush.msrb.mxu3 %v529_v28  ;;  %969 = vmatpush.msrb.mxu0 %v329_v9  ;;  %v381_v51 = vld [vmem:[%s3560_s1 + $0xb30] sm:$0xff]  ;;  %v198_v10 = vld [vmem:[%s3560_s1 + $0x578] sm:$0xff] }
 0x121   :  { %987 = vmatpush.msrb.mxu1 %v401_v29  ;;  %1009 = vmatpush.msrb.mxu2 %v457_v30  ;;  %v437_v54 = vld [vmem:[%s3560_s1 + $0xcf0] sm:$0xff]  ;;  %v644_v18 = vadd.f32 %v643_v53, %v624_v13  ;;  %v2848_v29 = vld.sshfl [vmem:[#allocation1 + $0x8] sm:$0xff pattern:$0x73625140]  ;;  %v138_v53 = vld [vmem:[%s3560_s1 + $0x398] sm:$0xff] }
 0x122   :  { %1028 = vmatpush.msrb.mxu3 %v525_v31  ;;  %970 = vmatpush.msrb.mxu0 %v325_v32  ;;  %v505_v55 = vld [vmem:[%s3560_s1 + $0xf10] sm:$0xff]  ;;  %v683_v32 = vpop.f32.mrf.mxu1 }
 0x123   :  { %988 = vmatpush.msrb.mxu1 %v397_v33  ;;  %1010 = vmatpush.msrb.mxu2 %v453_v16  ;;  %v305_v56 = vld [vmem:[%s3560_s1 + $0x8d0] sm:$0xff]  ;;  %v664_v25 = vadd.f32 %v663_v22, %v644_v18  ;;  %v703_v33 = vpop.f32.mrf.mxu2  ;;  %v134_v22 = vld [vmem:[%s3560_s1 + $0x378] sm:$0xff] }
 0x124   :  { %1029 = vmatpush.msrb.mxu3 %v521_v34  ;;  %971 = vmatpush.msrb.mxu0 %v321_v35  ;;  %v377_v57 = vld [vmem:[%s3560_s1 + $0xb10] sm:$0xff] }
 0x125   :  { %989 = vmatpush.msrb.mxu1 %v393_v36  ;;  %1011 = vmatpush.msrb.mxu2 %v449_v37  ;;  %v433_v60 = vld [vmem:[%s3560_s1 + $0xcd0] sm:$0xff]  ;;  %v684_v35 = vadd.f32 %v683_v32, %v664_v25  ;;  %v1236_v36 = vmul.f32 2.0, %v2831_v3  ;;  %v86_v37 = vld [vmem:[%s3560_s1 + $0x1f8] sm:$0xff] }
 0x126   :  { %1030 = vmatpush.msrb.mxu3 %v517_v38  ;;  %972 = vmatpush.msrb.mxu0 %v317_v39  ;;  %v501_v61 = vld [vmem:[%s3560_s1 + $0xef0] sm:$0xff]  ;;  %v214_v38 = vld [vmem:[%s3560_s1 + $0x5f8] sm:$0xff] }
 0x127   :  { %990 = vmatpush.msrb.mxu1 %v389_v40  ;;  %1012 = vmatpush.msrb.mxu2 %v445_v42  ;;  %v301_v63 = vld [vmem:[%s3560_s1 + $0x8b0] sm:$0xff]  ;;  %v704_v40 = vadd.f32 %v703_v33, %v684_v35  ;;  %v723_v42 = vpop.f32.mrf.mxu3  ;;  %v126_v32 = vld [vmem:[%s3560_s1 + $0x338] sm:$0xff] }
 0x128   :  { %1031 = vmatpush.msrb.mxu3 %v513_v43  ;;  %973 = vmatpush.msrb.mxu0 %v313_v44  ;;  %v373_v0 = vld [vmem:[%s3560_s1 + $0xaf0] sm:$0xff]  ;;  %v250_v33 = vld [vmem:[%s3560_s1 + $0x718] sm:$0xff] }
 0x129   :  { %991 = vmatpush.msrb.mxu1 %v385_v45  ;;  %1013 = vmatpush.msrb.mxu2 %v441_v46  ;;  %v429_v1 = vld [vmem:[%s3560_s1 + $0xcb0] sm:$0xff]  ;;  %v82_v45 = vld [vmem:[%s3560_s1 + $0x1d8] sm:$0xff]  ;;  %v2882_v46 = vadd.f32 %v723_v42, %v704_v40 }
 0x12a   :  { %1032 = vmatpush.msrb.mxu3 %v509_v48  ;;  %974 = vmatpush.msrb.mxu0 %v309_v50  ;;  %v497_v2 = vld [vmem:[%s3560_s1 + $0xed0] sm:$0xff]  ;;  %v1237_v48 = vsub.f32 1.0, %v1236_v36  ;;  %v278_v50 = vld [vmem:[%s3560_s1 + $0x7f8] sm:$0xff] }
 0x12b   :  { %992 = vmatpush.msrb.mxu1 %v381_v51  ;;  %1014 = vmatpush.msrb.mxu2 %v437_v54  ;;  %v297_v5 = vld [vmem:[%s3560_s1 + $0x890] sm:$0xff]  ;;  %v2890_v51 = vld.sshfl [vmem:[#allocation1 + $0x20] sm:$0xff pattern:$0x73625140]  ;;  %v178_v35 = vld [vmem:[%s3560_s1 + $0x4d8] sm:$0xff] }
 0x12c   :  { %1033 = vmatpush.msrb.mxu3 %v505_v55  ;;  %975 = vmatpush.msrb.mxu0 %v305_v56  ;;  %v369_v6 = vld [vmem:[%s3560_s1 + $0xad0] sm:$0xff]  ;;  %v78_v55 = vld [vmem:[%s3560_s1 + $0x1b8] sm:$0xff]  ;;  %v1207_v56 = vsel %vm1206_vm0, %v2882_v46, 0.0 }
 0x12d   :  { %993 = vmatpush.msrb.mxu1 %v377_v57  ;;  %1015 = vmatpush.msrb.mxu2 %v433_v60  ;;  %v425_v11 = vld [vmem:[%s3560_s1 + $0xc90] sm:$0xff]  ;;  %v2901_v57 = vld.sshfl [vmem:[#allocation1 + $0x38] sm:$0xff pattern:$0x73625140]  ;;  %v1208_v60 = vrot.slane %v1207_v56, 4 }
 0x12e   :  { %1034 = vmatpush.msrb.mxu3 %v501_v61  ;;  %976 = vmatpush.msrb.mxu0 %v301_v63  ;;  %v493_v12 = vld [vmem:[%s3560_s1 + $0xeb0] sm:$0xff]  ;;  %v150_v61 = vld [vmem:[%s3560_s1 + $0x3f8] sm:$0xff]  ;;  %v1238_v63 = vmul.f32 %v2831_v3, %v1237_v48 }
 0x12f   :  { %994 = vmatpush.msrb.mxu1 %v373_v0  ;;  %1016 = vmatpush.msrb.mxu2 %v429_v1  ;;  %v293_v47 = vld [vmem:[%s3560_s1 + $0x870] sm:$0xff]  ;;  %v74_v0 = vld [vmem:[%s3560_s1 + $0x198] sm:$0xff] }
 0x130   :  { %1035 = vmatpush.msrb.mxu3 %v497_v2  ;;  %977 = vmatpush.msrb.mxu0 %v297_v5  ;;  %v365_v52 = vld [vmem:[%s3560_s1 + $0xab0] sm:$0xff]  ;;  %v202_v1 = vld [vmem:[%s3560_s1 + $0x598] sm:$0xff]  ;;  %v1209_v2 = vadd.f32 %v1208_v60, %v1207_v56  ;;  %v1239_v13 = vadd.f32 %v2831_v3, %v1238_v63 }
 0x131   :  { %995 = vmatpush.msrb.mxu1 %v369_v6  ;;  %v421_v15 = vld [vmem:[%s3560_s1 + $0xc70] sm:$0xff]  ;;  %1017 = vmatpush.msrb.mxu2 %v425_v11  ;;  %v146_v5 = vld [vmem:[%s3560_s1 + $0x3d8] sm:$0xff] }
 0x132   :  { %1036 = vmatpush.msrb.mxu3 %v493_v12  ;;  %v489_v17 = vld [vmem:[%s3560_s1 + $0xe90] sm:$0xff]  ;;  %978 = vmatpush.msrb.mxu0 %v293_v47  ;;  %v270_v6 = vld [vmem:[%s3560_s1 + $0x7b8] sm:$0xff]  ;;  %v1210_v11 = vrot.slane %v1209_v2, 2 }
 0x133   :  { %v2813_v19 = vld.sshfl [vmem:[#allocation1 + $0x10] sm:$0xff pattern:$0x73625140]  ;;  %996 = vmatpush.msrb.mxu1 %v365_v52  ;;  %1018 = vmatpush.msrb.mxu2 %v421_v15  ;;  %v142_v12 = vld [vmem:[%s3560_s1 + $0x3b8] sm:$0xff] }
 0x134   :  { %942 = vmatmul.f32.vlgmr.msra.gmra.mxu2 %v2813_v19  ;;  %v289_v58 = vld [vmem:[%s3560_s1 + $0x850] sm:$0xff]  ;;  %1037 = vmatpush.msrb.mxu3 %v489_v17  ;;  %v266_v47 = vld [vmem:[%s3560_s1 + $0x798] sm:$0xff]  ;;  %v1211_v14 = vadd.f32 %v1210_v11, %v1209_v2 }
 0x135   :  { %v361_v20 = vld [vmem:[%s3560_s1 + $0xa90] sm:$0xff]  ;;  %902 = vmatmul.f32.vlgmr.msra.gmra.mxu0 %v2825_v23  ;;  %962 = vmatmul.f32.vlgmr.msra.gmra.mxu3 %v2833_v26  ;;  %v66_v52 = vld [vmem:[%s3560_s1 + $0x158] sm:$0xff] }
 0x136   :  { %v417_v21 = vld [vmem:[%s3560_s1 + $0xc50] sm:$0xff]  ;;  %979 = vmatpush.msrb.mxu0 %v289_v58  ;;  %997 = vmatpush.msrb.mxu1 %v361_v20  ;;  %v194_v15 = vld [vmem:[%s3560_s1 + $0x558] sm:$0xff]  ;;  %v1212_v18 = vrot.slane %v1211_v14, 1 }
 0x137   :  { %v485_v24 = vld [vmem:[%s3560_s1 + $0xe70] sm:$0xff]  ;;  %1019 = vmatpush.msrb.mxu2 %v417_v21  ;;  %922 = vmatmul.f32.vlgmr.msra.gmra.mxu1 %v2848_v29  ;;  %v262_v17 = vld [vmem:[%s3560_s1 + $0x778] sm:$0xff]  ;;  %v2962_v21 = vsel %vm1240_vm1, %v2831_v3, %v1239_v13 }
 0x138   :  { %v285_v27 = vld [vmem:[%s3560_s1 + $0x830] sm:$0xff]  ;;  %1038 = vmatpush.msrb.mxu3 %v485_v24  ;;  %v62_v58 = vld [vmem:[%s3560_s1 + $0x138] sm:$0xff]  ;;  %v1213_v25 = vadd.f32 %v1212_v18, %v1211_v14 }
 0x139   :  { %v357_v8 = vld [vmem:[%s3560_s1 + $0xa70] sm:$0xff]  ;;  %980 = vmatpush.msrb.mxu0 %v285_v27  ;;  %v190_v20 = vld [vmem:[%s3560_s1 + $0x538] sm:$0xff] }
 0x13a   :  { %v413_v28 = vld [vmem:[%s3560_s1 + $0xc30] sm:$0xff]  ;;  %998 = vmatpush.msrb.mxu1 %v357_v8  ;;  %v258_v24 = vld [vmem:[%s3560_s1 + $0x758] sm:$0xff] }
 0x13b   :  { %v481_v9 = vld [vmem:[%s3560_s1 + $0xe50] sm:$0xff]  ;;  %1020 = vmatpush.msrb.mxu2 %v413_v28  ;;  %v58_v27 = vld [vmem:[%s3560_s1 + $0x118] sm:$0xff] }
 0x13c   :  { %v281_v30 = vld [vmem:[%s3560_s1 + $0x810] sm:$0xff]  ;;  %1039 = vmatpush.msrb.mxu3 %v481_v9  ;;  %v186_v3 = vld [vmem:[%s3560_s1 + $0x518] sm:$0xff]  ;;  %v1242_v9 = vmul.f32 %v2962_v21, %v1213_v25 }
 0x13d   :  { %v353_v31 = vld [vmem:[%s3560_s1 + $0xa50] sm:$0xff]  ;;  %981 = vmatpush.msrb.mxu0 %v281_v30  ;;  %v130_v8 = vld [vmem:[%s3560_s1 + $0x358] sm:$0xff] }
 0x13e   :  { %v409_v16 = vld [vmem:[%s3560_s1 + $0xc10] sm:$0xff]  ;;  %999 = vmatpush.msrb.mxu1 %v353_v31  ;;  %982 = vmatmul.f32.vlgmr.msrb.gmra.mxu0 %v2890_v51  ;;  %v254_v28 = vld [vmem:[%s3560_s1 + $0x738] sm:$0xff] }
 0x13f   :  { %v477_v34 = vld [vmem:[%s3560_s1 + $0xe30] sm:$0xff]  ;;  %1021 = vmatpush.msrb.mxu2 %v409_v16  ;;  %1046 = vmatpush.msra.mxu0 %v86_v37  ;;  %v54_v30 = vld [vmem:[%s3560_s1 + $0xf8] sm:$0xff]  ;;  %v2996_v16 = vsub.f32 %v2882_v46, %v1242_v9 }
 0x140   :  { %v349_v39 = vld [vmem:[%s3560_s1 + $0xa30] sm:$0xff]  ;;  %1040 = vmatpush.msrb.mxu3 %v477_v34  ;;  %v182_v31 = vld [vmem:[%s3560_s1 + $0x4f8] sm:$0xff] }
 0x141   :  { %v473_v43 = vld [vmem:[%s3560_s1 + $0xe10] sm:$0xff]  ;;  %1086 = vmatpush.msra.mxu2 %v214_v38  ;;  %1000 = vmatpush.msrb.mxu1 %v349_v39  ;;  %v50_v34 = vld [vmem:[%s3560_s1 + $0xd8] sm:$0xff]  ;;  %v1250_v38 = vmul.f32 %v2996_v16, %v2996_v16 }
 0x142   :  { %v2876_v44 = vld.sshfl [vmem:[#allocation1 + $0x30] sm:$0xff pattern:$0x73625140]  ;;  %1041 = vmatpush.msrb.mxu3 %v473_v43  ;;  %1047 = vmatpush.msra.mxu0 %v82_v45  ;;  %v122_v36 = vld [vmem:[%s3560_s1 + $0x318] sm:$0xff] }
 0x143   :  { %1022 = vmatmul.f32.vlgmr.msrb.gmra.mxu2 %v2876_v44  ;;  %v345_v54 = vld [vmem:[%s3560_s1 + $0xa10] sm:$0xff]  ;;  %1042 = vmatmul.f32.vlgmr.msrb.gmra.mxu3 %v2901_v57  ;;  %v246_v37 = vld [vmem:[%s3560_s1 + $0x6f8] sm:$0xff]  ;;  %v1254_v45 = vsel %vm1206_vm0, %v1250_v38, 0.0 }
 0x144   :  { %1087 = vmatpush.msra.mxu2 %v210_v49  ;;  %1106 = vmatpush.msra.mxu3 %v278_v50  ;;  %v46_v39 = vld [vmem:[%s3560_s1 + $0xb8] sm:$0xff]  ;;  %v1255_v49 = vrot.slane %v1254_v45, 4 }
 0x145   :  { %1001 = vmatpush.msrb.mxu1 %v345_v54  ;;  %1048 = vmatpush.msra.mxu0 %v78_v55  ;;  %v174_v40 = vld [vmem:[%s3560_s1 + $0x4b8] sm:$0xff] }
 0x146   :  { %1002 = vmatmul.f32.vlgmr.msrb.gmra.mxu1 %v2920_v4  ;;  %1088 = vmatpush.msra.mxu2 %v206_v59  ;;  %v118_v42 = vld [vmem:[%s3560_s1 + $0x2f8] sm:$0xff]  ;;  %v1256_v59 = vadd.f32 %v1255_v49, %v1254_v45 }
 0x147   :  { %1066 = vmatpush.msra.mxu1 %v150_v61  ;;  %1107 = vmatpush.msra.mxu3 %v274_v62  ;;  %v242_v43 = vld [vmem:[%s3560_s1 + $0x6d8] sm:$0xff] }
 0x148   :  { %1049 = vmatpush.msra.mxu0 %v74_v0  ;;  %1089 = vmatpush.msra.mxu2 %v202_v1  ;;  %v42_v46 = vld [vmem:[%s3560_s1 + $0x98] sm:$0xff]  ;;  %v1257_v2 = vrot.slane %v1256_v59, 2 }
 0x149   :  { %1067 = vmatpush.msra.mxu1 %v146_v5  ;;  %1108 = vmatpush.msra.mxu3 %v270_v6  ;;  %v170_v48 = vld [vmem:[%s3560_s1 + $0x498] sm:$0xff] }
 0x14a   :  { %1050 = vmatpush.msra.mxu0 %v70_v7  ;;  %1090 = vmatpush.msra.mxu2 %v198_v10  ;;  %v114_v50 = vld [vmem:[%s3560_s1 + $0x2d8] sm:$0xff]  ;;  %v1258_v14 = vadd.f32 %v1257_v2, %v1256_v59 }
 0x14b   :  { %1068 = vmatpush.msra.mxu1 %v142_v12  ;;  %1109 = vmatpush.msra.mxu3 %v266_v47  ;;  %v238_v54 = vld [vmem:[%s3560_s1 + $0x6b8] sm:$0xff] }
 0x14c   :  { %1051 = vmatpush.msra.mxu0 %v66_v52  ;;  %1091 = vmatpush.msra.mxu2 %v194_v15  ;;  %v38_v55 = vld [vmem:[%s3560_s1 + $0x78] sm:$0xff] }
 0x14d   :  { %1069 = vmatpush.msra.mxu1 %v138_v53  ;;  %1110 = vmatpush.msra.mxu3 %v262_v17  ;;  %v166_v56 = vld [vmem:[%s3560_s1 + $0x478] sm:$0xff] }
 0x14e   :  { %1052 = vmatpush.msra.mxu0 %v62_v58  ;;  %1092 = vmatpush.msra.mxu2 %v190_v20  ;;  %v110_v60 = vld [vmem:[%s3560_s1 + $0x2b8] sm:$0xff] }
 0x14f   :  { %1070 = vmatpush.msra.mxu1 %v134_v22  ;;  %1111 = vmatpush.msra.mxu3 %v258_v24  ;;  %v234_v61 = vld [vmem:[%s3560_s1 + $0x698] sm:$0xff]  ;;  %v1259_v24 = vrot.slane %v1258_v14, 1 }
 0x150   :  { %1053 = vmatpush.msra.mxu0 %v58_v27  ;;  %1093 = vmatpush.msra.mxu2 %v186_v3  ;;  %v34_v62 = vld [vmem:[%s3560_s1 + $0x58] sm:$0xff] }
 0x151   :  { %1071 = vmatpush.msra.mxu1 %v130_v8  ;;  %1112 = vmatpush.msra.mxu3 %v254_v28  ;;  %v162_v63 = vld [vmem:[%s3560_s1 + $0x458] sm:$0xff] }
 0x152   :  { %1054 = vmatpush.msra.mxu0 %v54_v30  ;;  %1094 = vmatpush.msra.mxu2 %v182_v31  ;;  %v106_v0 = vld [vmem:[%s3560_s1 + $0x298] sm:$0xff] }
 0x153   :  { %1072 = vmatpush.msra.mxu1 %v126_v32  ;;  %1113 = vmatpush.msra.mxu3 %v250_v33  ;;  %v230_v1 = vld [vmem:[%s3560_s1 + $0x678] sm:$0xff]  ;;  %v1260_v32 = vadd.f32 %v1259_v24, %v1258_v14  ;;  %v803_v24 = vpop.f32.mrf.mxu3 }
 0x154   :  { %1055 = vmatpush.msra.mxu0 %v50_v34  ;;  %1095 = vmatpush.msra.mxu2 %v178_v35  ;;  %v30_v5 = vld [vmem:[%s3560_s1 + $0x38] sm:$0xff] }
 0x155   :  { %1073 = vmatpush.msra.mxu1 %v122_v36  ;;  %1114 = vmatpush.msra.mxu3 %v246_v37  ;;  %v158_v6 = vld [vmem:[%s3560_s1 + $0x438] sm:$0xff] }
 0x156   :  { %1056 = vmatpush.msra.mxu0 %v46_v39  ;;  %1096 = vmatpush.msra.mxu2 %v174_v40  ;;  %v102_v7 = vld [vmem:[%s3560_s1 + $0x278] sm:$0xff] }
 0x157   :  { %1074 = vmatpush.msra.mxu1 %v118_v42  ;;  %1115 = vmatpush.msra.mxu3 %v242_v43  ;;  %v226_v10 = vld [vmem:[%s3560_s1 + $0x658] sm:$0xff]  ;;  %v1282_v42 = vmul.f32 %v1260_v32, %v2962_v21 }
 0x158   :  { %1057 = vmatpush.msra.mxu0 %v42_v46  ;;  %1097 = vmatpush.msra.mxu2 %v170_v48  ;;  %v26_v11 = vld [vmem:[%s3560_s1 + $0x18] sm:$0xff] }
 0x159   :  { %1075 = vmatpush.msra.mxu1 %v114_v50  ;;  %1116 = vmatpush.msra.mxu3 %v238_v54  ;;  %v154_v12 = vld [vmem:[%s3560_s1 + $0x418] sm:$0xff]  ;;  %v3183_v59 = vadd.f32 1e-05, %v1282_v42 }
 0x15a   :  { %1058 = vmatpush.msra.mxu0 %v38_v55  ;;  %1098 = vmatpush.msra.mxu2 %v166_v56  ;;  %v98_v47 = vld [vmem:[%s3560_s1 + $0x258] sm:$0xff]  ;;  %v538_v56 = vperm.slane %v2732_v41, 1 }
 0x15b   :  { %1076 = vmatpush.msra.mxu1 %v110_v60  ;;  %1117 = vmatpush.msra.mxu3 %v234_v61  ;;  %v222_v13 = vld [vmem:[%s3560_s1 + $0x638] sm:$0xff]  ;;  %1585 = vrsqrt.f32 %v3183_v59  ;;  %vm1296_vm3 = vweird.f32 %v3183_v59 }
 0x15c   :  { %1059 = vmatpush.msra.mxu0 %v34_v62  ;;  %1099 = vmatpush.msra.mxu2 %v162_v63  ;;  %v342_v52 = vld [vmem:[%s3560_s1 + $0x9f8] sm:$0xff] }
 0x15d   :  { %1077 = vmatpush.msra.mxu1 %v106_v0  ;;  %1118 = vmatpush.msra.mxu3 %v230_v1  ;;  %v470_v15 = vld [vmem:[%s3560_s1 + $0xdf8] sm:$0xff]  ;;  %v743_v1 = vpop.f32.mrf.mxu0 }
 0x15e   :  { %1060 = vmatpush.msra.mxu0 %v30_v5  ;;  %1100 = vmatpush.msra.mxu2 %v158_v6  ;;  %v94_v53 = vld [vmem:[%s3560_s1 + $0x238] sm:$0xff]  ;;  %v744_v6 = vadd.f32 %v743_v1, %v538_v56 }
 0x15f   :  { %1078 = vmatpush.msra.mxu1 %v102_v7  ;;  %1119 = vmatpush.msra.mxu3 %v226_v10  ;;  %v218_v17 = vld [vmem:[%s3560_s1 + $0x618] sm:$0xff] }
 0x160   :  { %1061 = vmatpush.msra.mxu0 %v26_v11  ;;  %1101 = vmatpush.msra.mxu2 %v154_v12  ;;  %v338_v18 = vld [vmem:[%s3560_s1 + $0x9d8] sm:$0xff] }
 0x161   :  { %1079 = vmatpush.msra.mxu1 %v98_v47  ;;  %1120 = vmatpush.msra.mxu3 %v222_v13  ;;  %v466_v58 = vld [vmem:[%s3560_s1 + $0xdd8] sm:$0xff]  ;;  %v763_v47 = vpop.f32.mrf.mxu1 }
 0x162   :  { %1126 = vmatpush.msrb.mxu0 %v342_v52  ;;  %1166 = vmatpush.msrb.mxu2 %v470_v15  ;;  %v534_v20 = vld [vmem:[%s3560_s1 + $0xff8] sm:$0xff]  ;;  %v764_v52 = vadd.f32 %v763_v47, %v744_v6  ;;  %v783_v15 = vpop.f32.mrf.mxu2  ;;  %v1406_v47 = vld [vmem:[%s3562_s3 + $0xf0] sm:$0xff] }
 0x163   :  { %v90_v22 = vld [vmem:[%s3560_s1 + $0x218] sm:$0xff]  ;;  %1080 = vmatpush.msra.mxu1 %v94_v53  ;;  %1121 = vmatpush.msra.mxu3 %v218_v17 }
 0x164   :  { %v334_v25 = vld [vmem:[%s3560_s1 + $0x9b8] sm:$0xff]  ;;  %1127 = vmatpush.msrb.mxu0 %v338_v18  ;;  %1167 = vmatpush.msrb.mxu2 %v466_v58  ;;  %v784_v58 = vadd.f32 %v783_v15, %v764_v52  ;;  %v1382_v15 = vld [vmem:[%s3562_s3 + $0x30] sm:$0xff] }
 0x165   :  { %v406_v27 = vld [vmem:[%s3560_s1 + $0xbf8] sm:$0xff]  ;;  %1186 = vmatpush.msrb.mxu3 %v534_v20  ;;  %1081 = vmatpush.msra.mxu1 %v90_v22 }
 0x166   :  { %v462_v3 = vld [vmem:[%s3560_s1 + $0xdb8] sm:$0xff]  ;;  %1128 = vmatpush.msrb.mxu0 %v334_v25  ;;  %v3243_v25 = vpop.eup %1585  ;;  %1102 = vmatmul.f32.vlgmr.msra.gmra.mxu2 %v2813_v19 }
 0x167   :  { %v530_v8 = vld [vmem:[%s3560_s1 + $0xfd8] sm:$0xff]  ;;  %1146 = vmatpush.msrb.mxu1 %v406_v27  ;;  %1168 = vmatpush.msrb.mxu2 %v462_v3  ;;  %v804_v3 = vadd.f32 %v803_v24, %v784_v58  ;;  %vm1297_vm2 = vweird.f32 %v3243_v25  ;;  %v1404_v58 = vld [vmem:[%s3562_s3 + $0xe0] sm:$0xff] }
 0x168   :  { %v330_v28 = vld [vmem:[%s3560_s1 + $0x998] sm:$0xff]  ;;  %1187 = vmatpush.msrb.mxu3 %v530_v8  ;;  %1062 = vmatmul.f32.vlgmr.msra.gmra.mxu0 %v2825_v23  ;;  %vm1298_vm4 = vmor %vm1296_vm3, %vm1297_vm2 }
 0x169   :  { %v402_v9 = vld [vmem:[%s3560_s1 + $0xbd8] sm:$0xff]  ;;  %1129 = vmatpush.msrb.mxu0 %v330_v28  ;;  %1122 = vmatmul.f32.vlgmr.msra.gmra.mxu3 %v2833_v26 }
 0x16a   :  { %v458_v30 = vld [vmem:[%s3560_s1 + $0xd98] sm:$0xff]  ;;  %1147 = vmatpush.msrb.mxu1 %v402_v9 }
 0x16b   :  { %v526_v31 = vld [vmem:[%s3560_s1 + $0xfb8] sm:$0xff]  ;;  %1169 = vmatpush.msrb.mxu2 %v458_v30  ;;  %1082 = vmatmul.f32.vlgmr.msra.gmra.mxu1 %v2848_v29 }
 0x16c   :  { %v326_v33 = vld [vmem:[%s3560_s1 + $0x978] sm:$0xff]  ;;  %1188 = vmatpush.msrb.mxu3 %v526_v31  ;;  %v1291_v31 = vmul.f32 %v3243_v25, %v3183_v59 }
 0x16d   :  { %v398_v34 = vld [vmem:[%s3560_s1 + $0xbb8] sm:$0xff]  ;;  %1130 = vmatpush.msrb.mxu0 %v326_v33 }
 0x16e   :  { %v454_v35 = vld [vmem:[%s3560_s1 + $0xd78] sm:$0xff]  ;;  %1148 = vmatpush.msrb.mxu1 %v398_v34 }
 0x16f   :  { %v522_v36 = vld [vmem:[%s3560_s1 + $0xf98] sm:$0xff]  ;;  %1170 = vmatpush.msrb.mxu2 %v454_v35 }
 0x170   :  { %v322_v37 = vld [vmem:[%s3560_s1 + $0x958] sm:$0xff]  ;;  %1189 = vmatpush.msrb.mxu3 %v522_v36 }
 0x171   :  { %v394_v38 = vld [vmem:[%s3560_s1 + $0xb98] sm:$0xff]  ;;  %1131 = vmatpush.msrb.mxu0 %v322_v37 }
 0x172   :  { %v450_v39 = vld [vmem:[%s3560_s1 + $0xd58] sm:$0xff]  ;;  %1149 = vmatpush.msrb.mxu1 %v394_v38 }
 0x173   :  { %v518_v40 = vld [vmem:[%s3560_s1 + $0xf78] sm:$0xff]  ;;  %1171 = vmatpush.msrb.mxu2 %v450_v39  ;;  %v1292_v39 = vmul.f32 %v3243_v25, %v1291_v31 }
 0x174   :  { %v318_v43 = vld [vmem:[%s3560_s1 + $0x938] sm:$0xff]  ;;  %1190 = vmatpush.msrb.mxu3 %v518_v40  ;;  %v823_v30 = vpop.f32.mrf.mxu0 }
 0x175   :  { %v390_v45 = vld [vmem:[%s3560_s1 + $0xb78] sm:$0xff]  ;;  %1132 = vmatpush.msrb.mxu0 %v318_v43  ;;  %v824_v32 = vadd.f32 %v823_v30, %v804_v3 }
 0x176   :  { %v446_v46 = vld [vmem:[%s3560_s1 + $0xd38] sm:$0xff]  ;;  %1150 = vmatpush.msrb.mxu1 %v390_v45 }
 0x177   :  { %v514_v48 = vld [vmem:[%s3560_s1 + $0xf58] sm:$0xff]  ;;  %1172 = vmatpush.msrb.mxu2 %v446_v46 }
 0x178   :  { %v314_v49 = vld [vmem:[%s3560_s1 + $0x918] sm:$0xff]  ;;  %1191 = vmatpush.msrb.mxu3 %v514_v48 }
 0x179   :  { %v386_v50 = vld [vmem:[%s3560_s1 + $0xb58] sm:$0xff]  ;;  %1133 = vmatpush.msrb.mxu0 %v314_v49 }
 0x17a   :  { %v442_v54 = vld [vmem:[%s3560_s1 + $0xd18] sm:$0xff]  ;;  %1151 = vmatpush.msrb.mxu1 %v386_v50  ;;  %v1293_v50 = vmul.f32 0.5, %v1292_v39 }
 0x17b   :  { %v510_v55 = vld [vmem:[%s3560_s1 + $0xf38] sm:$0xff]  ;;  %1173 = vmatpush.msrb.mxu2 %v442_v54  ;;  %v843_v37 = vpop.f32.mrf.mxu1  ;;  %v1390_v54 = vld [vmem:[%s3562_s3 + $0x70] sm:$0xff] }
 0x17c   :  { %v310_v60 = vld [vmem:[%s3560_s1 + $0x8f8] sm:$0xff]  ;;  %1192 = vmatpush.msrb.mxu3 %v510_v55  ;;  %v863_v38 = vpop.f32.mrf.mxu2  ;;  %v844_v42 = vadd.f32 %v843_v37, %v824_v32  ;;  %v1401_v32 = vld [vmem:[%s3562_s3 + $0xc8] sm:$0xff]  ;;  %v1376_v37 = vld [vmem:[%s3562_s3] sm:$0xff] }
 0x17d   :  { %v382_v61 = vld [vmem:[%s3560_s1 + $0xb38] sm:$0xff]  ;;  %1134 = vmatpush.msrb.mxu0 %v310_v60 }
 0x17e   :  { %v438_v62 = vld [vmem:[%s3560_s1 + $0xcf8] sm:$0xff]  ;;  %1152 = vmatpush.msrb.mxu1 %v382_v61  ;;  %v864_v48 = vadd.f32 %v863_v38, %v844_v42  ;;  %v1398_v38 = vld [vmem:[%s3562_s3 + $0xb0] sm:$0xff] }
 0x17f   :  { %v506_v41 = vld [vmem:[%s3560_s1 + $0xf18] sm:$0xff]  ;;  %1174 = vmatpush.msrb.mxu2 %v438_v62  ;;  %v883_v49 = vpop.f32.mrf.mxu3  ;;  %v1294_v62 = vsub.f32 1.5, %v1293_v50  ;;  %v1393_v50 = vld [vmem:[%s3562_s3 + $0x88] sm:$0xff] }
 0x180   :  { %v306_v63 = vld [vmem:[%s3560_s1 + $0x8d8] sm:$0xff]  ;;  %1193 = vmatpush.msrb.mxu3 %v506_v41  ;;  %v884_v56 = vadd.f32 %v883_v49, %v864_v48  ;;  %v1388_v41 = vld [vmem:[%s3562_s3 + $0x60] sm:$0xff]  ;;  %v1394_v49 = vld [vmem:[%s3562_s3 + $0x90] sm:$0xff] }
 0x181   :  { %v378_v0 = vld [vmem:[%s3560_s1 + $0xb18] sm:$0xff]  ;;  %1135 = vmatpush.msrb.mxu0 %v306_v63 }
 0x182   :  { %v434_v2 = vld [vmem:[%s3560_s1 + $0xcd8] sm:$0xff]  ;;  %1153 = vmatpush.msrb.mxu1 %v378_v0  ;;  %v1214_v60 = vsel %vm1206_vm0, %v884_v56, 0.0  ;;  %v1295_v0 = vmul.f32 %v3243_v25, %v1294_v62 }
 0x183   :  { %v502_v5 = vld [vmem:[%s3560_s1 + $0xef8] sm:$0xff]  ;;  %1175 = vmatpush.msrb.mxu2 %v434_v2  ;;  %v1215_v61 = vrot.slane %v1214_v60, 4  ;;  %v1385_v2 = vld [vmem:[%s3562_s3 + $0x48] sm:$0xff] }
 0x184   :  { %v302_v7 = vld [vmem:[%s3560_s1 + $0x8b8] sm:$0xff]  ;;  %1194 = vmatpush.msrb.mxu3 %v502_v5  ;;  %v1299_v6 = vsel %vm1298_vm4, %v3243_v25, %v1295_v0  ;;  %v1380_v25 = vld [vmem:[%s3562_s3 + $0x20] sm:$0xff] }
 0x185   :  { %v374_v10 = vld [vmem:[%s3560_s1 + $0xaf8] sm:$0xff]  ;;  %1136 = vmatpush.msrb.mxu0 %v302_v7 }
 0x186   :  { %v430_v11 = vld [vmem:[%s3560_s1 + $0xcb8] sm:$0xff]  ;;  %1154 = vmatpush.msrb.mxu1 %v374_v10  ;;  %v1384_v10 = vld [vmem:[%s3562_s3 + $0x40] sm:$0xff] }
 0x187   :  { %v498_v12 = vld [vmem:[%s3560_s1 + $0xed8] sm:$0xff]  ;;  %1176 = vmatpush.msrb.mxu2 %v430_v11 }
 0x188   :  { %v298_v13 = vld [vmem:[%s3560_s1 + $0x898] sm:$0xff]  ;;  %1195 = vmatpush.msrb.mxu3 %v498_v12 }
 0x189   :  { %v370_v14 = vld [vmem:[%s3560_s1 + $0xad8] sm:$0xff]  ;;  %1137 = vmatpush.msrb.mxu0 %v298_v13  ;;  %v1330_v13 = vmul.f32 %v1299_v6, %v2996_v16 }
 0x18a   :  { %v426_v53 = vld [vmem:[%s3560_s1 + $0xc98] sm:$0xff]  ;;  %1155 = vmatpush.msrb.mxu1 %v370_v14 }
 0x18b   :  { %v494_v17 = vld [vmem:[%s3560_s1 + $0xeb8] sm:$0xff]  ;;  %1177 = vmatpush.msrb.mxu2 %v426_v53 }
 0x18c   :  { %v294_v18 = vld [vmem:[%s3560_s1 + $0x878] sm:$0xff]  ;;  %1196 = vmatpush.msrb.mxu3 %v494_v17  ;;  %v1405_v17 = vld [vmem:[%s3562_s3 + $0xe8] sm:$0xff] }
 0x18d   :  { %v366_v20 = vld [vmem:[%s3560_s1 + $0xab8] sm:$0xff]  ;;  %1138 = vmatpush.msrb.mxu0 %v294_v18  ;;  %v1381_v18 = vld [vmem:[%s3562_s3 + $0x28] sm:$0xff] }
 0x18e   :  { %v422_v22 = vld [vmem:[%s3560_s1 + $0xc78] sm:$0xff]  ;;  %1156 = vmatpush.msrb.mxu1 %v366_v20 }
 0x18f   :  { %v490_v27 = vld [vmem:[%s3560_s1 + $0xe98] sm:$0xff]  ;;  %1178 = vmatpush.msrb.mxu2 %v422_v22 }
 0x190   :  { %v290_v8 = vld [vmem:[%s3560_s1 + $0x858] sm:$0xff]  ;;  %1197 = vmatpush.msrb.mxu3 %v490_v27 }
 0x191   :  { %v362_v28 = vld [vmem:[%s3560_s1 + $0xa98] sm:$0xff]  ;;  %1139 = vmatpush.msrb.mxu0 %v290_v8 }
 0x192   :  { %v418_v9 = vld [vmem:[%s3560_s1 + $0xc58] sm:$0xff]  ;;  %1157 = vmatpush.msrb.mxu1 %v362_v28 }
 0x193   :  { %v486_v19 = vld [vmem:[%s3560_s1 + $0xe78] sm:$0xff]  ;;  %1179 = vmatpush.msrb.mxu2 %v418_v9  ;;  %v1402_v9 = vld [vmem:[%s3562_s3 + $0xd0] sm:$0xff] }
 0x194   :  { %v286_v33 = vld [vmem:[%s3560_s1 + $0x838] sm:$0xff]  ;;  %1198 = vmatpush.msrb.mxu3 %v486_v19  ;;  %v1378_v19 = vld [vmem:[%s3562_s3 + $0x10] sm:$0xff] }
 0x195   :  { %v358_v34 = vld [vmem:[%s3560_s1 + $0xa78] sm:$0xff]  ;;  %1140 = vmatpush.msrb.mxu0 %v286_v33 }
 0x196   :  { %v414_v23 = vld [vmem:[%s3560_s1 + $0xc38] sm:$0xff]  ;;  %1158 = vmatpush.msrb.mxu1 %v358_v34  ;;  %v1377_v34 = vld [vmem:[%s3562_s3 + $0x8] sm:$0xff] }
 0x197   :  { %v482_v35 = vld [vmem:[%s3560_s1 + $0xe58] sm:$0xff]  ;;  %1180 = vmatpush.msrb.mxu2 %v414_v23  ;;  %v1400_v23 = vld [vmem:[%s3562_s3 + $0xc0] sm:$0xff] }
 0x198   :  { %v282_v26 = vld [vmem:[%s3560_s1 + $0x818] sm:$0xff]  ;;  %1199 = vmatpush.msrb.mxu3 %v482_v35 }
 0x199   :  { %v354_v36 = vld [vmem:[%s3560_s1 + $0xa58] sm:$0xff]  ;;  %1141 = vmatpush.msrb.mxu0 %v282_v26 }
 0x19a   :  { %v410_v40 = vld [vmem:[%s3560_s1 + $0xc18] sm:$0xff]  ;;  %1159 = vmatpush.msrb.mxu1 %v354_v36  ;;  %1142 = vmatmul.f32.vlgmr.msrb.gmra.mxu0 %v2890_v51  ;;  %v1216_v51 = vadd.f32 %v1215_v61, %v1214_v60 }
 0x19b   :  { %v478_v29 = vld [vmem:[%s3560_s1 + $0xe38] sm:$0xff]  ;;  %1181 = vmatpush.msrb.mxu2 %v410_v40  ;;  %v1397_v40 = vld [vmem:[%s3562_s3 + $0xa8] sm:$0xff] }
 0x19c   :  { %v1391_v43 = vld [vmem:[%s3562_s3 + $0x78] sm:$0xff]  ;;  %1200 = vmatpush.msrb.mxu3 %v478_v29  ;;  %1182 = vmatmul.f32.vlgmr.msrb.gmra.mxu2 %v2876_v44  ;;  %v1389_v44 = vld [vmem:[%s3562_s3 + $0x68] sm:$0xff]  ;;  %v1217_v63 = vrot.slane %v1216_v51, 2 }
 0x19d   :  { %v350_v45 = vld [vmem:[%s3560_s1 + $0xa38] sm:$0xff]  ;;  %1442 = vmatpush.msra.mxu0 %v1391_v43  ;;  %v1396_v43 = vld [vmem:[%s3562_s3 + $0xa0] sm:$0xff] }
 0x19e   :  { %v474_v46 = vld [vmem:[%s3560_s1 + $0xe18] sm:$0xff]  ;;  %1160 = vmatpush.msrb.mxu1 %v350_v45  ;;  %v1218_v1 = vadd.f32 %v1217_v63, %v1216_v51 }
 0x19f   :  { %v346_v55 = vld [vmem:[%s3560_s1 + $0xa18] sm:$0xff]  ;;  %1201 = vmatpush.msrb.mxu3 %v474_v46  ;;  %1443 = vmatpush.msra.mxu0 %v1390_v54  ;;  %v1392_v54 = vld [vmem:[%s3562_s3 + $0x80] sm:$0xff] }
 0x1a0   :  { %1202 = vmatmul.f32.vlgmr.msrb.gmra.mxu3 %v2901_v57  ;;  %1161 = vmatpush.msrb.mxu1 %v346_v55  ;;  %v1387_v57 = vld [vmem:[%s3562_s3 + $0x58] sm:$0xff]  ;;  %v1219_v5 = vrot.slane %v1218_v1, 1 }
 0x1a1   :  { %1162 = vmatmul.f32.vlgmr.msrb.gmra.mxu1 %v2920_v4  ;;  %1444 = vmatpush.msra.mxu0 %v1389_v44  ;;  %v1386_v4 = vld [vmem:[%s3562_s3 + $0x50] sm:$0xff]  ;;  %v1407_v59 = vld [vmem:[%s3562_s3 + $0xf8] sm:$0xff] }
 0x1a2   :  { %v3333_v7 = vld [vmem:[%s3561_s2 + $0x1] ss:$8 sm:$0xf]  ;;  %v1220_v11 = vadd.f32 %v1219_v5, %v1218_v1  ;;  %1462 = vmatpush.msra.mxu1 %v1407_v59  ;;  %v3356_v53 = vld [vmem:[%s3561_s2 + $0x2] ss:$8 sm:$0xf] }
 0x1a3   :  { %1445 = vmatpush.msra.mxu0 %v1388_v41  ;;  %v1383_v12 = vld [vmem:[%s3562_s3 + $0x38] sm:$0xff]  ;;  %v1337_v14 = vperm.slane %v3333_v7, 0  ;;  %v1352_v24 = vperm.slane %v3356_v53, 0 }
 0x1a4   :  { %v1243_v52 = vmul.f32 %v2962_v21, %v1220_v11  ;;  %1463 = vmatpush.msra.mxu1 %v1406_v47  ;;  %v1403_v27 = vld [vmem:[%s3562_s3 + $0xd8] sm:$0xff]  ;;  %v1353_v11 = vperm.slane %v3356_v53, 1 }
 0x1a5   :  { %1446 = vmatpush.msra.mxu0 %v1387_v57  ;;  %v1345_v20 = vmul.f32 %v1337_v14, %v1330_v13  ;;  %v1379_v28 = vld [vmem:[%s3562_s3 + $0x18] sm:$0xff] }
 0x1a6   :  { %v3361_v16 = vsub.f32 %v884_v56, %v1243_v52  ;;  %1464 = vmatpush.msra.mxu1 %v1405_v17  ;;  %v1399_v35 = vld [vmem:[%s3562_s3 + $0xb8] sm:$0xff] }
 0x1a7   :  { %1447 = vmatpush.msra.mxu0 %v1386_v4  ;;  %v1360_v30 = vadd.f32 %v1352_v24, %v1345_v20  ;;  %v1395_v46 = vld [vmem:[%s3562_s3 + $0x98] sm:$0xff] }
 0x1a8   :  { %v1251_v22 = vmul.f32 %v3361_v16, %v3361_v16  ;;  %1465 = vmatpush.msra.mxu1 %v1404_v58  ;;  %v3428_v44 = vld [vmem:[%s3561_s2] ss:$8 sm:$0xf] }
 0x1a9   :  { %1448 = vmatpush.msra.mxu0 %v1385_v2  ;;  %v1368_v26 = vmul.f32 0.01, %v1360_v30  ;;  %vm1364_vm5 = vcmp.gt.f32.partialorder %v1360_v30, 0.0  ;;  %v539_v60 = vperm.slane %v3428_v44, 2  ;;  %v1338_v2 = vperm.slane %v3333_v7, 1 }
 0x1aa   :  { %v1261_v3 = vsel %vm1206_vm0, %v1251_v22, 0.0  ;;  %1466 = vmatpush.msra.mxu1 %v1403_v27 }
 0x1ab   :  { %1449 = vmatpush.msra.mxu0 %v1384_v10  ;;  %v1262_v8 = vrot.slane %v1261_v3, 4  ;;  %v1372_v29 = vsel %vm1364_vm5, %v1360_v30, %v1368_v26 }
 0x1ac   :  { %1467 = vmatpush.msra.mxu1 %v1402_v9  ;;  %v1422_v9 = vld [vmem:[%s3562_s3 + $0x170] sm:$0xff] }
 0x1ad   :  { %1450 = vmatpush.msra.mxu0 %v1383_v12  ;;  %v1263_v31 = vadd.f32 %v1262_v8, %v1261_v3  ;;  %v1423_v8 = vld [vmem:[%s3562_s3 + $0x178] sm:$0xff] }
 0x1ae   :  { %1468 = vmatpush.msra.mxu1 %v1401_v32  ;;  %1482 = vmatpush.msra.mxu2 %v1423_v8  ;;  %v1420_v32 = vld [vmem:[%s3562_s3 + $0x160] sm:$0xff] }
 0x1af   :  { %1451 = vmatpush.msra.mxu0 %v1382_v15  ;;  %v1264_v33 = vrot.slane %v1263_v31, 2 }
 0x1b0   :  { %1469 = vmatpush.msra.mxu1 %v1400_v23  ;;  %1483 = vmatpush.msra.mxu2 %v1422_v9 }
 0x1b1   :  { %1452 = vmatpush.msra.mxu0 %v1381_v18  ;;  %v1265_v36 = vadd.f32 %v1264_v33, %v1263_v31  ;;  %v1421_v31 = vld [vmem:[%s3562_s3 + $0x168] sm:$0xff] }
 0x1b2   :  { %1470 = vmatpush.msra.mxu1 %v1399_v35  ;;  %v903_v41 = vpop.f32.mrf.mxu0  ;;  %1484 = vmatpush.msra.mxu2 %v1421_v31  ;;  %v1418_v35 = vld [vmem:[%s3562_s3 + $0x150] sm:$0xff] }
 0x1b3   :  { %1453 = vmatpush.msra.mxu0 %v1380_v25  ;;  %v1266_v39 = vrot.slane %v1265_v36, 1  ;;  %v904_v51 = vadd.f32 %v903_v41, %v539_v60  ;;  %v1408_v41 = vld [vmem:[%s3562_s3 + $0x100] sm:$0xff] }
 0x1b4   :  { %1471 = vmatpush.msra.mxu1 %v1398_v38  ;;  %v923_v63 = vpop.f32.mrf.mxu1  ;;  %1485 = vmatpush.msra.mxu2 %v1420_v32  ;;  %v1416_v38 = vld [vmem:[%s3562_s3 + $0x140] sm:$0xff] }
 0x1b5   :  { %1454 = vmatpush.msra.mxu0 %v1379_v28  ;;  %v1267_v42 = vadd.f32 %v1266_v39, %v1265_v36  ;;  %v924_v4 = vadd.f32 %v923_v63, %v904_v51  ;;  %v1417_v36 = vld [vmem:[%s3562_s3 + $0x148] sm:$0xff]  ;;  %v540_v63 = vperm.slane %v3428_v44, 3  ;;  %v1354_v44 = vperm.slane %v3356_v53, 2 }
 0x1b6   :  { %1472 = vmatpush.msra.mxu1 %v1397_v40 }
 0x1b7   :  { %1455 = vmatpush.msra.mxu0 %v1378_v19  ;;  %v1283_v45 = vmul.f32 %v1267_v42, %v2962_v21  ;;  %v943_v1 = vpop.f32.mrf.mxu2 }
 0x1b8   :  { %1473 = vmatpush.msra.mxu1 %v1396_v43  ;;  %v944_v6 = vadd.f32 %v943_v1, %v924_v4  ;;  %v963_v59 = vpop.f32.mrf.mxu3  ;;  %v1414_v43 = vld [vmem:[%s3562_s3 + $0x130] sm:$0xff] }
 0x1b9   :  { %1456 = vmatpush.msra.mxu0 %v1377_v34  ;;  %v1287_v48 = vadd.f32 1e-05, %v1283_v45  ;;  %v1419_v34 = vld [vmem:[%s3562_s3 + $0x158] sm:$0xff] }
 0x1ba   :  { %1474 = vmatpush.msra.mxu1 %v1395_v46  ;;  %v964_v12 = vadd.f32 %v963_v59, %v944_v6  ;;  %1486 = vmatpush.msra.mxu2 %v1419_v34  ;;  %v1413_v46 = vld [vmem:[%s3562_s3 + $0x128] sm:$0xff] }
 0x1bb   :  { %1457 = vmatpush.msra.mxu0 %v1376_v37  ;;  %1587 = vrsqrt.f32 %v1287_v48  ;;  %vm1306_vm7 = vweird.f32 %v1287_v48  ;;  %v983_v13 = vpop.f32.mrf.mxu0 }
 0x1bc   :  { %1458 = vmatmul.f32.vlgmr.msra.gmra.mxu0 %v1372_v29  ;;  %1475 = vmatpush.msra.mxu1 %v1394_v49  ;;  %v984_v14 = vadd.f32 %v983_v13, %v964_v12  ;;  %v1415_v29 = vld [vmem:[%s3562_s3 + $0x138] sm:$0xff]  ;;  %v1412_v49 = vld [vmem:[%s3562_s3 + $0x120] sm:$0xff]  ;;  %v1339_v12 = vperm.slane %v3333_v7, 2 }
 0x1bd   :  { %1487 = vmatpush.msra.mxu2 %v1418_v35 }
 0x1be   :  { %1476 = vmatpush.msra.mxu1 %v1393_v50 }
 0x1bf   :  { %1488 = vmatpush.msra.mxu2 %v1417_v36 }
 0x1c0   :  { %1477 = vmatpush.msra.mxu1 %v1392_v54  ;;  %v1411_v54 = vld [vmem:[%s3562_s3 + $0x118] sm:$0xff] }
 0x1c1   :  { %v1588_v55 = vpop.eup %1587  ;;  %1489 = vmatpush.msra.mxu2 %v1416_v38 }
 0x1c2   :  { %v1301_v56 = vmul.f32 %v1588_v55, %v1287_v48  ;;  %vm1307_vm6 = vweird.f32 %v1588_v55 }
 0x1c3   :  { %vm1308_vm8 = vmor %vm1306_vm7, %vm1307_vm6  ;;  %v1003_v17 = vpop.f32.mrf.mxu1  ;;  %1490 = vmatpush.msra.mxu2 %v1415_v29  ;;  %v1432_v29 = vld [vmem:[%s3562_s3 + $0x1c0] sm:$0xff] }
 0x1c4   :  { %v1302_v61 = vmul.f32 %v1588_v55, %v1301_v56  ;;  %v1004_v58 = vadd.f32 %v1003_v17, %v984_v14  ;;  %v1410_v56 = vld [vmem:[%s3562_s3 + $0x110] sm:$0xff] }
 0x1c5   :  { %1491 = vmatpush.msra.mxu2 %v1414_v43  ;;  %v1431_v43 = vld [vmem:[%s3562_s3 + $0x1b8] sm:$0xff] }
 0x1c6   :  { %v1303_v62 = vmul.f32 0.5, %v1302_v61  ;;  %v1023_v18 = vpop.f32.mrf.mxu2  ;;  %v1043_v24 = vpop.f32.mrf.mxu3  ;;  %v1409_v61 = vld [vmem:[%s3562_s3 + $0x108] sm:$0xff] }
 0x1c7   :  { %v1024_v22 = vadd.f32 %v1023_v18, %v1004_v58  ;;  %1492 = vmatpush.msra.mxu2 %v1413_v46  ;;  %v1430_v46 = vld [vmem:[%s3562_s3 + $0x1b0] sm:$0xff] }
 0x1c8   :  { %v1304_v57 = vsub.f32 1.5, %v1303_v62 }
 0x1c9   :  { %v1044_v25 = vadd.f32 %v1043_v24, %v1024_v22  ;;  %1493 = vmatpush.msra.mxu2 %v1412_v49 }
 0x1ca   :  { %v1305_v0 = vmul.f32 %v1588_v55, %v1304_v57 }
 0x1cb   :  { %1494 = vmatpush.msra.mxu2 %v1411_v54 }
 0x1cc   :  { %v1309_v5 = vsel %vm1308_vm8, %v1588_v55, %v1305_v0 }
 0x1cd   :  { %v1331_v10 = vmul.f32 %v1309_v5, %v3361_v16  ;;  %v1221_v16 = vsel %vm1206_vm0, %v1044_v25, 0.0  ;;  %1495 = vmatpush.msra.mxu2 %v1410_v56 }
 0x1ce   :  { %v1222_v27 = vrot.slane %v1221_v16, 4 }
 0x1cf   :  { %v1346_v47 = vmul.f32 %v1338_v2, %v1331_v10  ;;  %1496 = vmatpush.msra.mxu2 %v1409_v61  ;;  %v1426_v61 = vld [vmem:[%s3562_s3 + $0x190] sm:$0xff] }
 0x1d0   :  { %v1223_v3 = vadd.f32 %v1222_v27, %v1221_v16 }
 0x1d1   :  { %v1361_v52 = vadd.f32 %v1353_v11, %v1346_v47  ;;  %1497 = vmatpush.msra.mxu2 %v1408_v41  ;;  %v1425_v41 = vld [vmem:[%s3562_s3 + $0x188] sm:$0xff] }
 0x1d2   :  { %v1224_v28 = vrot.slane %v1223_v3, 2 }
 0x1d3   :  { %vm1365_vm9 = vcmp.gt.f32.partialorder %v1361_v52, 0.0  ;;  %v1369_v15 = vmul.f32 0.01, %v1361_v52 }
 0x1d4   :  { %v1225_v30 = vadd.f32 %v1224_v28, %v1223_v3 }
 0x1d5   :  { %v1373_v20 = vsel %vm1365_vm9, %v1361_v52, %v1369_v15 }
 0x1d6   :  { %1478 = vmatmul.f32.vlgmr.msra.gmra.mxu1 %v1373_v20  ;;  %v1226_v19 = vrot.slane %v1225_v30, 1 }
 0x1d8   :  { %v1227_v33 = vadd.f32 %v1226_v19, %v1225_v30  ;;  %v1439_v30 = vld [vmem:[%s3562_s3 + $0x1f8] sm:$0xff]  ;;  %v1438_v19 = vld [vmem:[%s3562_s3 + $0x1f0] sm:$0xff] }
 0x1d9   :  { %1502 = vmatpush.msra.mxu3 %v1439_v30 }
 0x1da   :  { %v1244_v23 = vmul.f32 %v2962_v21, %v1227_v33  ;;  %v1437_v33 = vld [vmem:[%s3562_s3 + $0x1e8] sm:$0xff] }
 0x1db   :  { %1503 = vmatpush.msra.mxu3 %v1438_v19 }
 0x1dc   :  { %v1248_v26 = vsub.f32 %v1044_v25, %v1244_v23  ;;  %v1436_v23 = vld [vmem:[%s3562_s3 + $0x1e0] sm:$0xff] }
 0x1dd   :  { %1504 = vmatpush.msra.mxu3 %v1437_v33 }
 0x1de   :  { %v1252_v37 = vmul.f32 %v1248_v26, %v1248_v26 }
 0x1df   :  { %1505 = vmatpush.msra.mxu3 %v1436_v23 }
 0x1e0   :  { %v1268_v39 = vsel %vm1206_vm0, %v1252_v37, 0.0  ;;  %v1434_v37 = vld [vmem:[%s3562_s3 + $0x1d0] sm:$0xff] }
 0x1e1   :  { %v1269_v40 = vrot.slane %v1268_v39, 4 }
 0x1e3   :  { %v1270_v42 = vadd.f32 %v1269_v40, %v1268_v39  ;;  %v1433_v39 = vld [vmem:[%s3562_s3 + $0x1c8] sm:$0xff] }
 0x1e5   :  { %v1271_v45 = vrot.slane %v1270_v42, 2  ;;  %v1063_v1 = vpop.f32.mrf.mxu0 }
 0x1e6   :  { %v1064_v2 = vadd.f32 %v1063_v1, %v540_v63 }
 0x1e7   :  { %v1272_v48 = vadd.f32 %v1271_v45, %v1270_v42 }
 0x1e8   :  { %v1083_v6 = vpop.f32.mrf.mxu1 }
 0x1e9   :  { %v1273_v50 = vrot.slane %v1272_v48, 1  ;;  %v1084_v59 = vadd.f32 %v1083_v6, %v1064_v2  ;;  %v1103_v11 = vpop.f32.mrf.mxu2 }
 0x1eb   :  { %v1274_v55 = vadd.f32 %v1273_v50, %v1272_v48  ;;  %v1104_v13 = vadd.f32 %v1103_v11, %v1084_v59  ;;  %v1429_v50 = vld [vmem:[%s3562_s3 + $0x1a8] sm:$0xff]  ;;  %v1340_v11 = vperm.slane %v3333_v7, 3 }
 0x1ec   :  { %v1123_v52 = vpop.f32.mrf.mxu3 }
 0x1ed   :  { %v1284_v60 = vmul.f32 %v1274_v55, %v2962_v21  ;;  %v1124_v15 = vadd.f32 %v1123_v52, %v1104_v13  ;;  %v1428_v55 = vld [vmem:[%s3562_s3 + $0x1a0] sm:$0xff]  ;;  %v1355_v13 = vperm.slane %v3356_v53, 3 }
 0x1ef   :  { %v1288_v62 = vadd.f32 1e-05, %v1284_v60  ;;  %v1427_v60 = vld [vmem:[%s3562_s3 + $0x198] sm:$0xff] }
 0x1f1   :  { %1589 = vrsqrt.f32 %v1288_v62  ;;  %vm1316_vm11 = vweird.f32 %v1288_v62 }
 0x1f7   :  { %v1590_v51 = vpop.eup %1589 }
 0x1f8   :  { %v1311_v57 = vmul.f32 %v1590_v51, %v1288_v62  ;;  %vm1317_vm10 = vweird.f32 %v1590_v51 }
 0x1f9   :  { %vm1318_vm12 = vmor %vm1316_vm11, %vm1317_vm10 }
 0x1fa   :  { %v1312_v0 = vmul.f32 %v1590_v51, %v1311_v57  ;;  %v1424_v57 = vld [vmem:[%s3562_s3 + $0x180] sm:$0xff] }
 0x1fc   :  { %v1313_v4 = vmul.f32 0.5, %v1312_v0 }
 0x1fe   :  { %v1314_v5 = vsub.f32 1.5, %v1313_v4 }
 0x200   :  { %v1315_v10 = vmul.f32 %v1590_v51, %v1314_v5 }
 0x202   :  { %v1319_v47 = vsel %vm1318_vm12, %v1590_v51, %v1315_v10 }
 0x203   :  { %v1332_v14 = vmul.f32 %v1319_v47, %v1248_v26  ;;  %v1435_v26 = vld [vmem:[%s3562_s3 + $0x1d8] sm:$0xff] }
 0x204   :  { %1506 = vmatpush.msra.mxu3 %v1435_v26 }
 0x205   :  { %v1347_v17 = vmul.f32 %v1339_v12, %v1332_v14 }
 0x206   :  { %1507 = vmatpush.msra.mxu3 %v1434_v37 }
 0x207   :  { %v1362_v20 = vadd.f32 %v1354_v44, %v1347_v17  ;;  %v1580_v17 = vld [vmem:[%s3563_s4] ss:$0 sm:$0xff] }
 0x208   :  { %1508 = vmatpush.msra.mxu3 %v1433_v39 }
 0x209   :  { %vm1366_vm13 = vcmp.gt.f32.partialorder %v1362_v20, 0.0  ;;  %v1370_v25 = vmul.f32 0.01, %v1362_v20 }
 0x20a   :  { %1509 = vmatpush.msra.mxu3 %v1432_v29 }
 0x20b   :  { %v1374_v3 = vsel %vm1366_vm13, %v1362_v20, %v1370_v25 }
 0x20c   :  { %1498 = vmatmul.f32.vlgmr.msra.gmra.mxu2 %v1374_v3  ;;  %1510 = vmatpush.msra.mxu3 %v1431_v43 }
 0x20e   :  { %1511 = vmatpush.msra.mxu3 %v1430_v46 }
 0x210   :  { %1512 = vmatpush.msra.mxu3 %v1429_v50 }
 0x212   :  { %1513 = vmatpush.msra.mxu3 %v1428_v55 }
 0x214   :  { %1514 = vmatpush.msra.mxu3 %v1427_v60 }
 0x216   :  { %1515 = vmatpush.msra.mxu3 %v1426_v61 }
 0x217   :  { %v1143_v18 = vpop.f32.mrf.mxu0 }
 0x218   :  { %v1144_v58 = vadd.f32 %v1143_v18, %v1124_v15  ;;  %1516 = vmatpush.msra.mxu3 %v1425_v41 }
 0x21a   :  { %1517 = vmatpush.msra.mxu3 %v1424_v57 }
 0x21e   :  { %v1163_v22 = vpop.f32.mrf.mxu1 }
 0x21f   :  { %v1164_v24 = vadd.f32 %v1163_v22, %v1144_v58  ;;  %v1183_v16 = vpop.f32.mrf.mxu2 }
 0x221   :  { %v1184_v27 = vadd.f32 %v1183_v16, %v1164_v24 }
 0x223   :  { %v1203_v8 = vpop.f32.mrf.mxu3 }
 0x224   :  { %v1204_v28 = vadd.f32 %v1203_v8, %v1184_v27 }
 0x226   :  { %v1228_v9 = vsel %vm1206_vm0, %v1204_v28, 0.0 }
 0x227   :  { %v1229_v31 = vrot.slane %v1228_v9, 4 }
 0x229   :  { %v1230_v32 = vadd.f32 %v1229_v31, %v1228_v9 }
 0x22b   :  { %v1231_v34 = vrot.slane %v1230_v32, 2 }
 0x22d   :  { %v1232_v35 = vadd.f32 %v1231_v34, %v1230_v32 }
 0x22f   :  { %v1233_v36 = vrot.slane %v1232_v35, 1 }
 0x231   :  { %v1234_v38 = vadd.f32 %v1233_v36, %v1232_v35 }
 0x233   :  { %v1245_v40 = vmul.f32 %v2962_v21, %v1234_v38 }
 0x235   :  { %v1249_v42 = vsub.f32 %v1204_v28, %v1245_v40 }
 0x237   :  { %v1253_v45 = vmul.f32 %v1249_v42, %v1249_v42 }
 0x239   :  { %v1275_v48 = vsel %vm1206_vm0, %v1253_v45, 0.0  ;;  %v1459_v18 = vpop.f32.mrf.mxu0 }
 0x23a   :  { %v1276_v49 = vrot.slane %v1275_v48, 4  ;;  %v1460_v20 = vadd.f32 %v1580_v17, %v1459_v18 }
 0x23c   :  { %v1277_v54 = vadd.f32 %v1276_v49, %v1275_v48  ;;  %v1581_v48 = vld [vmem:[%s3563_s4 + $0x1] ss:$0 sm:$0xff] }
 0x23e   :  { %v1278_v56 = vrot.slane %v1277_v54, 2 }
 0x240   :  { %v1279_v62 = vadd.f32 %v1278_v56, %v1277_v54 }
 0x242   :  { %v1280_v51 = vrot.slane %v1279_v62, 1 }
 0x244   :  { %v1281_v63 = vadd.f32 %v1280_v51, %v1279_v62 }
 0x246   :  { %v1285_v0 = vmul.f32 %v1281_v63, %v2962_v21 }
 0x248   :  { %v1289_v4 = vadd.f32 1e-05, %v1285_v0 }
 0x24a   :  { %1591 = vrsqrt.f32 %v1289_v4  ;;  %vm1326_vm15 = vweird.f32 %v1289_v4 }
 0x250   :  { %v1592_v1 = vpop.eup %1591 }
 0x251   :  { %v1321_v2 = vmul.f32 %v1592_v1, %v1289_v4  ;;  %vm1327_vm14 = vweird.f32 %v1592_v1 }
 0x252   :  { %vm1328_vm1 = vmor %vm1326_vm15, %vm1327_vm14 }
 0x253   :  { %v1322_v5 = vmul.f32 %v1592_v1, %v1321_v2  ;;  %v1479_v58 = vpop.f32.mrf.mxu1 }
 0x254   :  { %v1480_v24 = vadd.f32 %v1479_v58, %v1460_v20 }
 0x255   :  { %v1323_v6 = vmul.f32 0.5, %v1322_v5 }
 0x257   :  { %v1324_v10 = vsub.f32 1.5, %v1323_v6 }
 0x259   :  { %v1325_v59 = vmul.f32 %v1592_v1, %v1324_v10 }
 0x25b   :  { %v1329_v12 = vsel %vm1328_vm1, %v1592_v1, %v1325_v59 }
 0x25c   :  { %v1333_v47 = vmul.f32 %v1329_v12, %v1249_v42 }
 0x25e   :  { %v1348_v14 = vmul.f32 %v1340_v11, %v1333_v47 }
 0x260   :  { %v1363_v52 = vadd.f32 %v1355_v13, %v1348_v14 }
 0x262   :  { %vm1367_vm2 = vcmp.gt.f32.partialorder %v1363_v52, 0.0  ;;  %v1371_v44 = vmul.f32 0.01, %v1363_v52 }
 0x264   :  { %v1375_v15 = vsel %vm1367_vm2, %v1363_v52, %v1371_v44 }
 0x265   :  { %1518 = vmatmul.f32.vlgmr.msra.gmra.mxu3 %v1375_v15 }
 0x28f   :  { %v1499_v22 = vpop.f32.mrf.mxu2 }
 0x290   :  { %v1500_v7 = vadd.f32 %v1499_v22, %v1480_v24 }
 0x2e8   :  { %v1519_v25 = vpop.f32.mrf.mxu3 }
 0x2e9   :  { %v1520_v16 = vadd.f32 %v1519_v25, %v1500_v7 }
 0x2eb   :  { %v1522_v53 = vsel %vm1206_vm0, %v1520_v16, 0.0 }
 0x2ec   :  { %v1523_v27 = vrot.slane %v1522_v53, 4 }
 0x2ee   :  { %v1524_v3 = vadd.f32 %v1523_v27, %v1522_v53 }
 0x2f0   :  { %v1525_v8 = vrot.slane %v1524_v3, 2 }
 0x2f2   :  { %v1526_v28 = vadd.f32 %v1525_v8, %v1524_v3 }
 0x2f4   :  { %v1527_v9 = vrot.slane %v1526_v28, 1 }
 0x2f6   :  { %v1528_v30 = vadd.f32 %v1527_v9, %v1526_v28 }
 0x2f8   :  { %v1529_v31 = vmul.f32 %v1528_v30, %v2962_v21 }
 0x2fa   :  { %v1530_v19 = vsub.f32 %v1520_v16, %v1529_v31 }
 0x2fc   :  { %v1531_v32 = vmul.f32 %v1530_v19, %v1530_v19 }
 0x2fe   :  { %v1532_v33 = vsel %vm1206_vm0, %v1531_v32, 0.0 }
 0x2ff   :  { %v1533_v34 = vrot.slane %v1532_v33, 4 }
 0x301   :  { %v1534_v23 = vadd.f32 %v1533_v34, %v1532_v33 }
 0x303   :  { %v1535_v35 = vrot.slane %v1534_v23, 2 }
 0x305   :  { %v1536_v26 = vadd.f32 %v1535_v35, %v1534_v23 }
 0x307   :  { %v1537_v36 = vrot.slane %v1536_v26, 1 }
 0x309   :  { %v1538_v37 = vadd.f32 %v1537_v36, %v1536_v26 }
 0x30b   :  { %v1539_v38 = vmul.f32 %v1538_v37, %v2962_v21  ;;  %v1582_v21 = vld [vmem:[%s3563_s4 + $0x2] ss:$0 sm:$0xff] }
 0x30d   :  { %v1540_v39 = vadd.f32 1e-05, %v1539_v38 }
 0x30f   :  { %1593 = vrsqrt.f32 %v1540_v39  ;;  %vm1547_vm4 = vweird.f32 %v1540_v39 }
 0x315   :  { %v1594_v40 = vpop.eup %1593 }
 0x316   :  { %v1542_v29 = vmul.f32 %v1594_v40, %v1540_v39  ;;  %vm1548_vm3 = vweird.f32 %v1594_v40 }
 0x317   :  { %vm1549_vm5 = vmor %vm1547_vm4, %vm1548_vm3 }
 0x318   :  { %v1543_v42 = vmul.f32 %v1594_v40, %v1542_v29 }
 0x31a   :  { %v1544_v43 = vmul.f32 0.5, %v1543_v42 }
 0x31c   :  { %v1545_v45 = vsub.f32 1.5, %v1544_v43 }
 0x31e   :  { %v1546_v46 = vmul.f32 %v1594_v40, %v1545_v45 }
 0x320   :  { %v1550_v49 = vsel %vm1549_vm5, %v1594_v40, %v1546_v46 }
 0x321   :  { %v1551_v50 = vmul.f32 %v1550_v49, %v1530_v19 }
 0x323   :  { %v1554_v54 = vmul.f32 %v1581_v48, %v1551_v50 }
 0x325   :  { %v1557_v55 = vadd.f32 %v1582_v21, %v1554_v54 }
 0x327   :  { %v1558_v56 = vmax.f32 %v1557_v55, 0.0 }
 0x329   :  { %1559 = vst [vmem:[#allocation2] sm:$0x3] %v1558_v56 }
 0x32a   :  { %1570 = dma.vmem_to_hbm [thread:$0]  %s1566_s17, 32, %s1568_s20, [#allocation3]  }
 0x32b   :  { %1628 = dma.done.wait [#allocation3], 32  }
 0x32c   :  { %1629 = vsyncadd [#allocation3], 4294967264 }
 0x32d   :  { %1575 = vsyncpa [#allocation3], 1 }

</bundles_post_ra>
